<compile_context>
chip_gen: v7x
topology: tpu7x:2x2x1
jax: 0.10.0
libtpu: 0.0.40
codegen_flags: <defaults>
</compile_context>

<pallas_src>
import numpy as np
import jax
import jax.numpy as jnp
from jax.experimental import pallas as pl
from jax.experimental.pallas import tpu as pltpu

LEAKY_RELU_GAIN = float(np.sqrt(2.0 / (1.0 + 0.2 ** 2)))
NUM_LAYERS = 8
LANE = 128          # vreg lane width (last dim)
BATCH_ALIGN = 16    # batch-tile granularity: satisfies bf16 (16,128) and f32 (8,128)
# Static per-layer negative slopes; None == no activation (last Linear).
SLOPES = (0.01,) + (0.2,) * (NUM_LAYERS - 2) + (None,)


def _round_up(x, m):
    return (x + m - 1) // m * m


# ---------------------------------------------------------------------------
# Kernel
# ---------------------------------------------------------------------------
def style_mapper_kernel(z_ref, *refs):
    """Fused 8-layer MLP on one batch tile. Weights are pre-scaled bf16."""
    ws = refs[:NUM_LAYERS]                    # each (in_pad, out_pad), bf16, VMEM
    bs = refs[NUM_LAYERS:2 * NUM_LAYERS]      # each (1, out_pad), f32, VMEM
    out_ref = refs[2 * NUM_LAYERS]

    x = z_ref[...]                            # (tb, zin_pad), bf16 (MXU-ready)
    for i in range(NUM_LAYERS):
        # bf16 MXU operands, f32 accumulation; Weight_Scaling already folded
        # into ws[i]. Bias-add / LeakyReLU stay in f32.
        x = jnp.dot(x, ws[i][...], preferred_element_type=jnp.float32) + bs[i][...]
        if SLOPES[i] is not None:
            # LeakyReLU via mul+max (valid since slope < 1): fewer VALU ops in
            # the serial inter-layer epilogue than compare+select.
            x = jnp.maximum(x, SLOPES[i] * x)
        if i + 1 < NUM_LAYERS:
            x = x.astype(jnp.bfloat16)        # operand for the next matmul
    out_ref[...] = x.astype(out_ref.dtype)


# ---------------------------------------------------------------------------
# Parameter preparation (one-time, host side)
# ---------------------------------------------------------------------------
def scale_fold(weights_io):
    """Fold Weight_Scaling's kaiming constant into the (in, out) weights."""
    return [w * (LEAKY_RELU_GAIN / np.sqrt(w.shape[0])) for w in weights_io]


def prepare_params(weights_io, biases):
    """Scale-fold, cast weights to bf16, zero-pad feature dims to 128 lanes."""
    ws_scaled = scale_fold(weights_io)
    ws_pad, bs_pad = [], []
    for w, b in zip(ws_scaled, biases):
        fi, fo = w.shape
        fip, fop = _round_up(fi, LANE), _round_up(fo, LANE)
        w_bf16 = w.astype(jnp.bfloat16)
        ws_pad.append(jnp.pad(w_bf16, ((0, fip - fi), (0, fop - fo))))
        bs_pad.append(jnp.pad(b.reshape(1, -1).astype(jnp.float32),
                              ((0, 0), (0, fop - fo))))
    return ws_pad, bs_pad


# ---------------------------------------------------------------------------
# Forward wrapper
# ---------------------------------------------------------------------------
def style_mapper_forward(z, ws_pad, bs_pad, *, style_size, tile_b=1024):
    """z: (B, z_size) f32. ws_pad[i]: (in_pad, out_pad) bf16. bs_pad[i]: (1, out_pad) f32."""
    B, z_size = z.shape
    zin_pad = ws_pad[0].shape[0]
    out_pad_w = ws_pad[-1].shape[1]
    max_feat = max([zin_pad] + [int(w.shape[1]) for w in ws_pad])

    # ---- Generation-aware VMEM budget --------------------------------------
    try:
        vmem_cap = int(pltpu.get_tpu_info().vmem_capacity_bytes)
    except Exception:
        vmem_cap = 64 << 20                    # conservative: v7x per-TC VMEM
    budget = min(vmem_cap * 3 // 4, 100 << 20)  # ~96 MiB on v5e/v6e, ~48 MiB on v7x

    w_bytes = sum(int(np.prod(w.shape)) * 2 for w in ws_pad)
    b_bytes = sum(int(np.prod(bb.shape)) * 4 for bb in bs_pad)
    resident = w_bytes + b_bytes               # weights/biases held VMEM-resident

    # Per-batch-row VMEM: double-buffered bf16 z tile + double-buffered f32 out
    # tile + ~4 live f32 activation buffers along the layer chain.
    per_row = 2 * 2 * zin_pad + 2 * 4 * out_pad_w + 4 * 4 * max_feat
    tb_cap = (budget - 2 * resident - (4 << 20)) // per_row
    tb_cap = max(BATCH_ALIGN, (tb_cap // BATCH_ALIGN) * BATCH_ALIGN)

    # ---- Batch tiling -------------------------------------------------------
    b_al = _round_up(B, BATCH_ALIGN)
    tile_b = max(BATCH_ALIGN, (int(tile_b) // BATCH_ALIGN) * BATCH_ALIGN)  # clamp
    tb = min(tile_b, b_al, tb_cap)
    n_tiles = pl.cdiv(b_al, tb)
    # v7x megacore: keep >= 2 grid steps for large batches so both TCs get work.
    if n_tiles == 1 and b_al >= 512:
        n_tiles = 2
    # Balance tiles so batch padding waste is at most BATCH_ALIGN-1 rows/tile.
    tb = _round_up(pl.cdiv(b_al, n_tiles), BATCH_ALIGN)
    b_pad = tb * n_tiles

    # bf16 input tile: halves z DMA and removes the head-of-chain cast.
    z_p = jnp.pad(z.astype(jnp.bfloat16),
                  ((0, b_pad - B), (0, zin_pad - z_size)))

    # ---- Cost estimate & VMEM limit ----------------------------------------
    flops = 2 * b_pad * sum(int(w.shape[0]) * int(w.shape[1]) for w in ws_pad)
    bytes_accessed = b_pad * zin_pad * 2 + b_pad * out_pad_w * 4 + w_bytes + b_bytes
    cost = pl.CostEstimate(flops=flops, transcendentals=0,
                           bytes_accessed=bytes_accessed)

    footprint = 2 * resident + per_row * tb + (4 << 20)   # 2x covers fallback path
    vmem_limit = int(min(max(footprint, 16 << 20), budget))

    def _run(const_pipeline_mode):
        def const_spec(shape):
            # Grid-invariant blocks (weights/biases): never re-fetched.
            if const_pipeline_mode is None:
                return pl.BlockSpec(shape, lambda b: (0, 0))
            return pl.BlockSpec(shape, lambda b: (0, 0),
                                pipeline_mode=const_pipeline_mode)

        in_specs = [pl.BlockSpec((tb, zin_pad), lambda b: (b, 0))]
        in_specs += [const_spec(w.shape) for w in ws_pad]
        in_specs += [const_spec(bb.shape) for bb in bs_pad]
        out_spec = pl.BlockSpec((tb, out_pad_w), lambda b: (b, 0))

        return pl.pallas_call(
            style_mapper_kernel,
            out_shape=jax.ShapeDtypeStruct((b_pad, out_pad_w), jnp.float32),
            grid=(n_tiles,),
            in_specs=in_specs,
            out_specs=out_spec,
            cost_estimate=cost,
            compiler_params=pltpu.CompilerParams(
                dimension_semantics=("parallel",),   # batch axis: megacore-shardable
                vmem_limit_bytes=vmem_limit),
        )(z_p, *ws_pad, *bs_pad)

    try:
        # Single-buffer the grid-invariant weights/biases (reclaims ~half their VMEM).
        out_padded = _run(pl.Buffered(1))
    except Exception:
        # Fallback if this lowering rejects single-buffered pipeline_mode.
        out_padded = _run(None)

    return out_padded[:B, :style_size]


# ---------------------------------------------------------------------------
# Params + reference
# ---------------------------------------------------------------------------
def make_params(key, z_size, style_size):
    """Synthetic params matching init_weights: W ~ N(0,1), b = 0. Weights are
    returned pre-transposed to (in, out) so the kernel computes x @ W + b."""
    in_sizes = [z_size] + [style_size] * (NUM_LAYERS - 1)
    out_sizes = [style_size] * NUM_LAYERS
    weights_io, biases = [], []
    for fi, fo in zip(in_sizes, out_sizes):
        key, sub = jax.random.split(key)
        w_oi = jax.random.normal(sub, (fo, fi), dtype=jnp.float32)  # PyTorch (out, in)
        weights_io.append(jnp.transpose(w_oi))                      # -> (in, out)
        biases.append(jnp.zeros((fo,), dtype=jnp.float32))
    return weights_io, biases


def reference_forward(z, weights_io, biases):
    """Plain-JAX reference with the same numerics as the kernel
    (scale folded into weights, bf16 matmul operands, f32 accumulation)."""
    ws = scale_fold(weights_io)
    x = z.astype(jnp.float32)
    for i, (w, b) in enumerate(zip(ws, biases)):
        x = jnp.dot(x.astype(jnp.bfloat16), w.astype(jnp.bfloat16),
                    preferred_element_type=jnp.float32) + b
        if SLOPES[i] is not None:
            x = jnp.where(x > 0, x, SLOPES[i] * x)
    return x


if __name__ == "__main__":
    key = jax.random.PRNGKey(0)
    batch, z_size, style_size = 8, 32, 32

    key, kz = jax.random.split(key)
    z = jax.random.normal(kz, (batch, z_size), dtype=jnp.float32)

    weights_io, biases = make_params(key, z_size, style_size)

    # One-time parameter prep (scale fold + bf16 cast + lane padding).
    ws_pad, bs_pad = prepare_params(weights_io, biases)

    out = style_mapper_forward(z, ws_pad, bs_pad, style_size=style_size)
    out = jax.block_until_ready(out)

    ref = jax.block_until_ready(reference_forward(z, weights_io, biases))
    np.testing.assert_allclose(np.asarray(out), np.asarray(ref),
                               rtol=1e-3, atol=1e-3)

    print("KERNEL_OK")
</pallas_src>

<mosaic_0001>
module attributes {stable_mosaic.version = 11 : i64} {
  func.func @style_mapper_kernel(%arg0: i32, %arg1: memref<16x128xbf16, #tpu.memory_space<vmem>>, %arg2: memref<128x128xbf16, #tpu.memory_space<vmem>>, %arg3: memref<128x128xbf16, #tpu.memory_space<vmem>>, %arg4: memref<128x128xbf16, #tpu.memory_space<vmem>>, %arg5: memref<128x128xbf16, #tpu.memory_space<vmem>>, %arg6: memref<128x128xbf16, #tpu.memory_space<vmem>>, %arg7: memref<128x128xbf16, #tpu.memory_space<vmem>>, %arg8: memref<128x128xbf16, #tpu.memory_space<vmem>>, %arg9: memref<128x128xbf16, #tpu.memory_space<vmem>>, %arg10: memref<1x128xf32, #tpu.memory_space<vmem>>, %arg11: memref<1x128xf32, #tpu.memory_space<vmem>>, %arg12: memref<1x128xf32, #tpu.memory_space<vmem>>, %arg13: memref<1x128xf32, #tpu.memory_space<vmem>>, %arg14: memref<1x128xf32, #tpu.memory_space<vmem>>, %arg15: memref<1x128xf32, #tpu.memory_space<vmem>>, %arg16: memref<1x128xf32, #tpu.memory_space<vmem>>, %arg17: memref<1x128xf32, #tpu.memory_space<vmem>>, %arg18: memref<16x128xf32, #tpu.memory_space<vmem>>) attributes {dimension_semantics = [#tpu.dimension_semantics<parallel>], iteration_bounds = array<i64: 1>, scalar_prefetch = 0 : i64, scratch_operands = 0 : i64, tpu.core_type = #tpu.core_type<tc>, window_params = [{transform_indices = @transform_0, window_bounds = array<i64: 16, 128>}, {pipeline_mode = #tpu.pipeline_mode<synchronous>, transform_indices = @transform_1, window_bounds = array<i64: 128, 128>}, {pipeline_mode = #tpu.pipeline_mode<synchronous>, transform_indices = @transform_2, window_bounds = array<i64: 128, 128>}, {pipeline_mode = #tpu.pipeline_mode<synchronous>, transform_indices = @transform_3, window_bounds = array<i64: 128, 128>}, {pipeline_mode = #tpu.pipeline_mode<synchronous>, transform_indices = @transform_4, window_bounds = array<i64: 128, 128>}, {pipeline_mode = #tpu.pipeline_mode<synchronous>, transform_indices = @transform_5, window_bounds = array<i64: 128, 128>}, {pipeline_mode = #tpu.pipeline_mode<synchronous>, transform_indices = @transform_6, window_bounds = array<i64: 128, 128>}, {pipeline_mode = #tpu.pipeline_mode<synchronous>, transform_indices = @transform_7, window_bounds = array<i64: 128, 128>}, {pipeline_mode = #tpu.pipeline_mode<synchronous>, transform_indices = @transform_8, window_bounds = array<i64: 128, 128>}, {pipeline_mode = #tpu.pipeline_mode<synchronous>, transform_indices = @transform_9, window_bounds = array<i64: 1, 128>}, {pipeline_mode = #tpu.pipeline_mode<synchronous>, transform_indices = @transform_10, window_bounds = array<i64: 1, 128>}, {pipeline_mode = #tpu.pipeline_mode<synchronous>, transform_indices = @transform_11, window_bounds = array<i64: 1, 128>}, {pipeline_mode = #tpu.pipeline_mode<synchronous>, transform_indices = @transform_12, window_bounds = array<i64: 1, 128>}, {pipeline_mode = #tpu.pipeline_mode<synchronous>, transform_indices = @transform_13, window_bounds = array<i64: 1, 128>}, {pipeline_mode = #tpu.pipeline_mode<synchronous>, transform_indices = @transform_14, window_bounds = array<i64: 1, 128>}, {pipeline_mode = #tpu.pipeline_mode<synchronous>, transform_indices = @transform_15, window_bounds = array<i64: 1, 128>}, {pipeline_mode = #tpu.pipeline_mode<synchronous>, transform_indices = @transform_16, window_bounds = array<i64: 1, 128>}, {transform_indices = @transform_17, window_bounds = array<i64: 16, 128>}]} {
    %c0 = arith.constant 0 : index
    %c0_0 = arith.constant 0 : index
    %0 = vector.load %arg1[%c0, %c0_0] : memref<16x128xbf16, #tpu.memory_space<vmem>>, vector<16x128xbf16>
    %c0_1 = arith.constant 0 : index
    %c0_2 = arith.constant 0 : index
    %1 = vector.load %arg2[%c0_1, %c0_2] : memref<128x128xbf16, #tpu.memory_space<vmem>>, vector<128x128xbf16>
    %cst = arith.constant dense<0.000000e+00> : vector<16x128xf32>
    %2 = tpu.matmul %0, %1, %cst {dimension_numbers = #tpu.dot_dimension_numbers<[1], [0], [0], [1], [0, 0, 1, 1], [], []>} : vector<16x128xbf16>, vector<128x128xbf16>, vector<16x128xf32> -> vector<16x128xf32>
    %c0_3 = arith.constant 0 : index
    %c0_4 = arith.constant 0 : index
    %3 = vector.load %arg10[%c0_3, %c0_4] : memref<1x128xf32, #tpu.memory_space<vmem>>, vector<1x128xf32>
    %4 = vector.broadcast %3 : vector<1x128xf32> to vector<16x128xf32>
    %5 = arith.addf %2, %4 : vector<16x128xf32>
    %cst_5 = arith.constant 0.00999999977 : f32
    %6 = vector.broadcast %cst_5 : f32 to vector<16x128xf32>
    %7 = arith.mulf %6, %5 : vector<16x128xf32>
    %8 = arith.maximumf %5, %7 : vector<16x128xf32>
    %9 = arith.truncf %8 : vector<16x128xf32> to vector<16x128xbf16>
    %c0_6 = arith.constant 0 : index
    %c0_7 = arith.constant 0 : index
    %10 = vector.load %arg3[%c0_6, %c0_7] : memref<128x128xbf16, #tpu.memory_space<vmem>>, vector<128x128xbf16>
    %cst_8 = arith.constant dense<0.000000e+00> : vector<16x128xf32>
    %11 = tpu.matmul %9, %10, %cst_8 {dimension_numbers = #tpu.dot_dimension_numbers<[1], [0], [0], [1], [0, 0, 1, 1], [], []>} : vector<16x128xbf16>, vector<128x128xbf16>, vector<16x128xf32> -> vector<16x128xf32>
    %c0_9 = arith.constant 0 : index
    %c0_10 = arith.constant 0 : index
    %12 = vector.load %arg11[%c0_9, %c0_10] : memref<1x128xf32, #tpu.memory_space<vmem>>, vector<1x128xf32>
    %13 = vector.broadcast %12 : vector<1x128xf32> to vector<16x128xf32>
    %14 = arith.addf %11, %13 : vector<16x128xf32>
    %cst_11 = arith.constant 2.000000e-01 : f32
    %15 = vector.broadcast %cst_11 : f32 to vector<16x128xf32>
    %16 = arith.mulf %15, %14 : vector<16x128xf32>
    %17 = arith.maximumf %14, %16 : vector<16x128xf32>
    %18 = arith.truncf %17 : vector<16x128xf32> to vector<16x128xbf16>
    %c0_12 = arith.constant 0 : index
    %c0_13 = arith.constant 0 : index
    %19 = vector.load %arg4[%c0_12, %c0_13] : memref<128x128xbf16, #tpu.memory_space<vmem>>, vector<128x128xbf16>
    %cst_14 = arith.constant dense<0.000000e+00> : vector<16x128xf32>
    %20 = tpu.matmul %18, %19, %cst_14 {dimension_numbers = #tpu.dot_dimension_numbers<[1], [0], [0], [1], [0, 0, 1, 1], [], []>} : vector<16x128xbf16>, vector<128x128xbf16>, vector<16x128xf32> -> vector<16x128xf32>
    %c0_15 = arith.constant 0 : index
    %c0_16 = arith.constant 0 : index
    %21 = vector.load %arg12[%c0_15, %c0_16] : memref<1x128xf32, #tpu.memory_space<vmem>>, vector<1x128xf32>
    %22 = vector.broadcast %21 : vector<1x128xf32> to vector<16x128xf32>
    %23 = arith.addf %20, %22 : vector<16x128xf32>
    %cst_17 = arith.constant 2.000000e-01 : f32
    %24 = vector.broadcast %cst_17 : f32 to vector<16x128xf32>
    %25 = arith.mulf %24, %23 : vector<16x128xf32>
    %26 = arith.maximumf %23, %25 : vector<16x128xf32>
    %27 = arith.truncf %26 : vector<16x128xf32> to vector<16x128xbf16>
    %c0_18 = arith.constant 0 : index
    %c0_19 = arith.constant 0 : index
    %28 = vector.load %arg5[%c0_18, %c0_19] : memref<128x128xbf16, #tpu.memory_space<vmem>>, vector<128x128xbf16>
    %cst_20 = arith.constant dense<0.000000e+00> : vector<16x128xf32>
    %29 = tpu.matmul %27, %28, %cst_20 {dimension_numbers = #tpu.dot_dimension_numbers<[1], [0], [0], [1], [0, 0, 1, 1], [], []>} : vector<16x128xbf16>, vector<128x128xbf16>, vector<16x128xf32> -> vector<16x128xf32>
    %c0_21 = arith.constant 0 : index
    %c0_22 = arith.constant 0 : index
    %30 = vector.load %arg13[%c0_21, %c0_22] : memref<1x128xf32, #tpu.memory_space<vmem>>, vector<1x128xf32>
    %31 = vector.broadcast %30 : vector<1x128xf32> to vector<16x128xf32>
    %32 = arith.addf %29, %31 : vector<16x128xf32>
    %cst_23 = arith.constant 2.000000e-01 : f32
    %33 = vector.broadcast %cst_23 : f32 to vector<16x128xf32>
    %34 = arith.mulf %33, %32 : vector<16x128xf32>
    %35 = arith.maximumf %32, %34 : vector<16x128xf32>
    %36 = arith.truncf %35 : vector<16x128xf32> to vector<16x128xbf16>
    %c0_24 = arith.constant 0 : index
    %c0_25 = arith.constant 0 : index
    %37 = vector.load %arg6[%c0_24, %c0_25] : memref<128x128xbf16, #tpu.memory_space<vmem>>, vector<128x128xbf16>
    %cst_26 = arith.constant dense<0.000000e+00> : vector<16x128xf32>
    %38 = tpu.matmul %36, %37, %cst_26 {dimension_numbers = #tpu.dot_dimension_numbers<[1], [0], [0], [1], [0, 0, 1, 1], [], []>} : vector<16x128xbf16>, vector<128x128xbf16>, vector<16x128xf32> -> vector<16x128xf32>
    %c0_27 = arith.constant 0 : index
    %c0_28 = arith.constant 0 : index
    %39 = vector.load %arg14[%c0_27, %c0_28] : memref<1x128xf32, #tpu.memory_space<vmem>>, vector<1x128xf32>
    %40 = vector.broadcast %39 : vector<1x128xf32> to vector<16x128xf32>
    %41 = arith.addf %38, %40 : vector<16x128xf32>
    %cst_29 = arith.constant 2.000000e-01 : f32
    %42 = vector.broadcast %cst_29 : f32 to vector<16x128xf32>
    %43 = arith.mulf %42, %41 : vector<16x128xf32>
    %44 = arith.maximumf %41, %43 : vector<16x128xf32>
    %45 = arith.truncf %44 : vector<16x128xf32> to vector<16x128xbf16>
    %c0_30 = arith.constant 0 : index
    %c0_31 = arith.constant 0 : index
    %46 = vector.load %arg7[%c0_30, %c0_31] : memref<128x128xbf16, #tpu.memory_space<vmem>>, vector<128x128xbf16>
    %cst_32 = arith.constant dense<0.000000e+00> : vector<16x128xf32>
    %47 = tpu.matmul %45, %46, %cst_32 {dimension_numbers = #tpu.dot_dimension_numbers<[1], [0], [0], [1], [0, 0, 1, 1], [], []>} : vector<16x128xbf16>, vector<128x128xbf16>, vector<16x128xf32> -> vector<16x128xf32>
    %c0_33 = arith.constant 0 : index
    %c0_34 = arith.constant 0 : index
    %48 = vector.load %arg15[%c0_33, %c0_34] : memref<1x128xf32, #tpu.memory_space<vmem>>, vector<1x128xf32>
    %49 = vector.broadcast %48 : vector<1x128xf32> to vector<16x128xf32>
    %50 = arith.addf %47, %49 : vector<16x128xf32>
    %cst_35 = arith.constant 2.000000e-01 : f32
    %51 = vector.broadcast %cst_35 : f32 to vector<16x128xf32>
    %52 = arith.mulf %51, %50 : vector<16x128xf32>
    %53 = arith.maximumf %50, %52 : vector<16x128xf32>
    %54 = arith.truncf %53 : vector<16x128xf32> to vector<16x128xbf16>
    %c0_36 = arith.constant 0 : index
    %c0_37 = arith.constant 0 : index
    %55 = vector.load %arg8[%c0_36, %c0_37] : memref<128x128xbf16, #tpu.memory_space<vmem>>, vector<128x128xbf16>
    %cst_38 = arith.constant dense<0.000000e+00> : vector<16x128xf32>
    %56 = tpu.matmul %54, %55, %cst_38 {dimension_numbers = #tpu.dot_dimension_numbers<[1], [0], [0], [1], [0, 0, 1, 1], [], []>} : vector<16x128xbf16>, vector<128x128xbf16>, vector<16x128xf32> -> vector<16x128xf32>
    %c0_39 = arith.constant 0 : index
    %c0_40 = arith.constant 0 : index
    %57 = vector.load %arg16[%c0_39, %c0_40] : memref<1x128xf32, #tpu.memory_space<vmem>>, vector<1x128xf32>
    %58 = vector.broadcast %57 : vector<1x128xf32> to vector<16x128xf32>
    %59 = arith.addf %56, %58 : vector<16x128xf32>
    %cst_41 = arith.constant 2.000000e-01 : f32
    %60 = vector.broadcast %cst_41 : f32 to vector<16x128xf32>
    %61 = arith.mulf %60, %59 : vector<16x128xf32>
    %62 = arith.maximumf %59, %61 : vector<16x128xf32>
    %63 = arith.truncf %62 : vector<16x128xf32> to vector<16x128xbf16>
    %c0_42 = arith.constant 0 : index
    %c0_43 = arith.constant 0 : index
    %64 = vector.load %arg9[%c0_42, %c0_43] : memref<128x128xbf16, #tpu.memory_space<vmem>>, vector<128x128xbf16>
    %cst_44 = arith.constant dense<0.000000e+00> : vector<16x128xf32>
    %65 = tpu.matmul %63, %64, %cst_44 {dimension_numbers = #tpu.dot_dimension_numbers<[1], [0], [0], [1], [0, 0, 1, 1], [], []>} : vector<16x128xbf16>, vector<128x128xbf16>, vector<16x128xf32> -> vector<16x128xf32>
    %c0_45 = arith.constant 0 : index
    %c0_46 = arith.constant 0 : index
    %66 = vector.load %arg17[%c0_45, %c0_46] : memref<1x128xf32, #tpu.memory_space<vmem>>, vector<1x128xf32>
    %67 = vector.broadcast %66 : vector<1x128xf32> to vector<16x128xf32>
    %68 = arith.addf %65, %67 : vector<16x128xf32>
    %c0_47 = arith.constant 0 : index
    %c0_48 = arith.constant 0 : index
    %69 = vector.load %arg18[%c0_47, %c0_48] : memref<16x128xf32, #tpu.memory_space<vmem>>, vector<16x128xf32>
    tpu.vector_store %arg18[%c0_47, %c0_48], %68 {strides = array<i32>} : memref<16x128xf32, #tpu.memory_space<vmem>>, vector<16x128xf32>,
    return
  }
  func.func @transform_0(%arg0: i32) -> (i32, i32) {
    %c0_i32 = arith.constant 0 : i32
    %c0_i32_0 = arith.constant 0 : i32
    return %arg0, %c0_i32 : i32, i32
  }
  func.func @transform_1(%arg0: i32) -> (i32, i32) {
    %c0_i32 = arith.constant 0 : i32
    %c0_i32_0 = arith.constant 0 : i32
    %c0_i32_1 = arith.constant 0 : i32
    return %c0_i32, %c0_i32_0 : i32, i32
  }
  func.func @transform_2(%arg0: i32) -> (i32, i32) {
    %c0_i32 = arith.constant 0 : i32
    %c0_i32_0 = arith.constant 0 : i32
    %c0_i32_1 = arith.constant 0 : i32
    return %c0_i32, %c0_i32_0 : i32, i32
  }
  func.func @transform_3(%arg0: i32) -> (i32, i32) {
    %c0_i32 = arith.constant 0 : i32
    %c0_i32_0 = arith.constant 0 : i32
    %c0_i32_1 = arith.constant 0 : i32
    return %c0_i32, %c0_i32_0 : i32, i32
  }
  func.func @transform_4(%arg0: i32) -> (i32, i32) {
    %c0_i32 = arith.constant 0 : i32
    %c0_i32_0 = arith.constant 0 : i32
    %c0_i32_1 = arith.constant 0 : i32
    return %c0_i32, %c0_i32_0 : i32, i32
  }
  func.func @transform_5(%arg0: i32) -> (i32, i32) {
    %c0_i32 = arith.constant 0 : i32
    %c0_i32_0 = arith.constant 0 : i32
    %c0_i32_1 = arith.constant 0 : i32
    return %c0_i32, %c0_i32_0 : i32, i32
  }
  func.func @transform_6(%arg0: i32) -> (i32, i32) {
    %c0_i32 = arith.constant 0 : i32
    %c0_i32_0 = arith.constant 0 : i32
    %c0_i32_1 = arith.constant 0 : i32
    return %c0_i32, %c0_i32_0 : i32, i32
  }
  func.func @transform_7(%arg0: i32) -> (i32, i32) {
    %c0_i32 = arith.constant 0 : i32
    %c0_i32_0 = arith.constant 0 : i32
    %c0_i32_1 = arith.constant 0 : i32
    return %c0_i32, %c0_i32_0 : i32, i32
  }
  func.func @transform_8(%arg0: i32) -> (i32, i32) {
    %c0_i32 = arith.constant 0 : i32
    %c0_i32_0 = arith.constant 0 : i32
    %c0_i32_1 = arith.constant 0 : i32
    return %c0_i32, %c0_i32_0 : i32, i32
  }
  func.func @transform_9(%arg0: i32) -> (i32, i32) {
    %c0_i32 = arith.constant 0 : i32
    %c0_i32_0 = arith.constant 0 : i32
    %c0_i32_1 = arith.constant 0 : i32
    return %c0_i32, %c0_i32_0 : i32, i32
  }
  func.func @transform_10(%arg0: i32) -> (i32, i32) {
    %c0_i32 = arith.constant 0 : i32
    %c0_i32_0 = arith.constant 0 : i32
    %c0_i32_1 = arith.constant 0 : i32
    return %c0_i32, %c0_i32_0 : i32, i32
  }
  func.func @transform_11(%arg0: i32) -> (i32, i32) {
    %c0_i32 = arith.constant 0 : i32
    %c0_i32_0 = arith.constant 0 : i32
    %c0_i32_1 = arith.constant 0 : i32
    return %c0_i32, %c0_i32_0 : i32, i32
  }
  func.func @transform_12(%arg0: i32) -> (i32, i32) {
    %c0_i32 = arith.constant 0 : i32
    %c0_i32_0 = arith.constant 0 : i32
    %c0_i32_1 = arith.constant 0 : i32
    return %c0_i32, %c0_i32_0 : i32, i32
  }
  func.func @transform_13(%arg0: i32) -> (i32, i32) {
    %c0_i32 = arith.constant 0 : i32
    %c0_i32_0 = arith.constant 0 : i32
    %c0_i32_1 = arith.constant 0 : i32
    return %c0_i32, %c0_i32_0 : i32, i32
  }
  func.func @transform_14(%arg0: i32) -> (i32, i32) {
    %c0_i32 = arith.constant 0 : i32
    %c0_i32_0 = arith.constant 0 : i32
    %c0_i32_1 = arith.constant 0 : i32
    return %c0_i32, %c0_i32_0 : i32, i32
  }
  func.func @transform_15(%arg0: i32) -> (i32, i32) {
    %c0_i32 = arith.constant 0 : i32
    %c0_i32_0 = arith.constant 0 : i32
    %c0_i32_1 = arith.constant 0 : i32
    return %c0_i32, %c0_i32_0 : i32, i32
  }
  func.func @transform_16(%arg0: i32) -> (i32, i32) {
    %c0_i32 = arith.constant 0 : i32
    %c0_i32_0 = arith.constant 0 : i32
    %c0_i32_1 = arith.constant 0 : i32
    return %c0_i32, %c0_i32_0 : i32, i32
  }
  func.func @transform_17(%arg0: i32) -> (i32, i32) {
    %c0_i32 = arith.constant 0 : i32
    %c0_i32_0 = arith.constant 0 : i32
    return %arg0, %c0_i32 : i32, i32
  }
}

module attributes {stable_mosaic.version = 11 : i64} {
  func.func @style_mapper_kernel(%arg0: i32, %arg1: memref<16x128xbf16, #tpu.memory_space<vmem>>, %arg2: memref<128x128xbf16, #tpu.memory_space<vmem>>, %arg3: memref<128x128xbf16, #tpu.memory_space<vmem>>, %arg4: memref<128x128xbf16, #tpu.memory_space<vmem>>, %arg5: memref<128x128xbf16, #tpu.memory_space<vmem>>, %arg6: memref<128x128xbf16, #tpu.memory_space<vmem>>, %arg7: memref<128x128xbf16, #tpu.memory_space<vmem>>, %arg8: memref<128x128xbf16, #tpu.memory_space<vmem>>, %arg9: memref<128x128xbf16, #tpu.memory_space<vmem>>, %arg10: memref<1x128xf32, #tpu.memory_space<vmem>>, %arg11: memref<1x128xf32, #tpu.memory_space<vmem>>, %arg12: memref<1x128xf32, #tpu.memory_space<vmem>>, %arg13: memref<1x128xf32, #tpu.memory_space<vmem>>, %arg14: memref<1x128xf32, #tpu.memory_space<vmem>>, %arg15: memref<1x128xf32, #tpu.memory_space<vmem>>, %arg16: memref<1x128xf32, #tpu.memory_space<vmem>>, %arg17: memref<1x128xf32, #tpu.memory_space<vmem>>, %arg18: memref<16x128xf32, #tpu.memory_space<vmem>>) attributes {dimension_semantics = [#tpu.dimension_semantics<parallel>], iteration_bounds = array<i64: 1>, scalar_prefetch = 0 : i64, scratch_operands = 0 : i64, tpu.core_type = #tpu.core_type<tc>, window_params = [{transform_indices = @transform_0, window_bounds = array<i64: 16, 128>}, {pipeline_mode = #tpu.pipeline_mode<synchronous>, transform_indices = @transform_1, window_bounds = array<i64: 128, 128>}, {pipeline_mode = #tpu.pipeline_mode<synchronous>, transform_indices = @transform_2, window_bounds = array<i64: 128, 128>}, {pipeline_mode = #tpu.pipeline_mode<synchronous>, transform_indices = @transform_3, window_bounds = array<i64: 128, 128>}, {pipeline_mode = #tpu.pipeline_mode<synchronous>, transform_indices = @transform_4, window_bounds = array<i64: 128, 128>}, {pipeline_mode = #tpu.pipeline_mode<synchronous>, transform_indices = @transform_5, window_bounds = array<i64: 128, 128>}, {pipeline_mode = #tpu.pipeline_mode<synchronous>, transform_indices = @transform_6, window_bounds = array<i64: 128, 128>}, {pipeline_mode = #tpu.pipeline_mode<synchronous>, transform_indices = @transform_7, window_bounds = array<i64: 128, 128>}, {pipeline_mode = #tpu.pipeline_mode<synchronous>, transform_indices = @transform_8, window_bounds = array<i64: 128, 128>}, {pipeline_mode = #tpu.pipeline_mode<synchronous>, transform_indices = @transform_9, window_bounds = array<i64: 1, 128>}, {pipeline_mode = #tpu.pipeline_mode<synchronous>, transform_indices = @transform_10, window_bounds = array<i64: 1, 128>}, {pipeline_mode = #tpu.pipeline_mode<synchronous>, transform_indices = @transform_11, window_bounds = array<i64: 1, 128>}, {pipeline_mode = #tpu.pipeline_mode<synchronous>, transform_indices = @transform_12, window_bounds = array<i64: 1, 128>}, {pipeline_mode = #tpu.pipeline_mode<synchronous>, transform_indices = @transform_13, window_bounds = array<i64: 1, 128>}, {pipeline_mode = #tpu.pipeline_mode<synchronous>, transform_indices = @transform_14, window_bounds = array<i64: 1, 128>}, {pipeline_mode = #tpu.pipeline_mode<synchronous>, transform_indices = @transform_15, window_bounds = array<i64: 1, 128>}, {pipeline_mode = #tpu.pipeline_mode<synchronous>, transform_indices = @transform_16, window_bounds = array<i64: 1, 128>}, {transform_indices = @transform_17, window_bounds = array<i64: 16, 128>}]} {
    %c0 = arith.constant 0 : index
    %c0_0 = arith.constant 0 : index
    %0 = vector.load %arg1[%c0, %c0_0] : memref<16x128xbf16, #tpu.memory_space<vmem>>, vector<16x128xbf16>
    %c0_1 = arith.constant 0 : index
    %c0_2 = arith.constant 0 : index
    %1 = vector.load %arg2[%c0_1, %c0_2] : memref<128x128xbf16, #tpu.memory_space<vmem>>, vector<128x128xbf16>
    %cst = arith.constant dense<0.000000e+00> : vector<16x128xf32>
    %2 = tpu.matmul %0, %1, %cst {dimension_numbers = #tpu.dot_dimension_numbers<[1], [0], [0], [1], [0, 0, 1, 1], [], []>} : vector<16x128xbf16>, vector<128x128xbf16>, vector<16x128xf32> -> vector<16x128xf32>
    %c0_3 = arith.constant 0 : index
    %c0_4 = arith.constant 0 : index
    %3 = vector.load %arg10[%c0_3, %c0_4] : memref<1x128xf32, #tpu.memory_space<vmem>>, vector<1x128xf32>
    %4 = vector.broadcast %3 : vector<1x128xf32> to vector<16x128xf32>
    %5 = arith.addf %2, %4 : vector<16x128xf32>
    %cst_5 = arith.constant 0.00999999977 : f32
    %6 = vector.broadcast %cst_5 : f32 to vector<16x128xf32>
    %7 = arith.mulf %6, %5 : vector<16x128xf32>
    %8 = arith.maximumf %5, %7 : vector<16x128xf32>
    %9 = arith.truncf %8 : vector<16x128xf32> to vector<16x128xbf16>
    %c0_6 = arith.constant 0 : index
    %c0_7 = arith.constant 0 : index
    %10 = vector.load %arg3[%c0_6, %c0_7] : memref<128x128xbf16, #tpu.memory_space<vmem>>, vector<128x128xbf16>
    %cst_8 = arith.constant dense<0.000000e+00> : vector<16x128xf32>
    %11 = tpu.matmul %9, %10, %cst_8 {dimension_numbers = #tpu.dot_dimension_numbers<[1], [0], [0], [1], [0, 0, 1, 1], [], []>} : vector<16x128xbf16>, vector<128x128xbf16>, vector<16x128xf32> -> vector<16x128xf32>
    %c0_9 = arith.constant 0 : index
    %c0_10 = arith.constant 0 : index
    %12 = vector.load %arg11[%c0_9, %c0_10] : memref<1x128xf32, #tpu.memory_space<vmem>>, vector<1x128xf32>
    %13 = vector.broadcast %12 : vector<1x128xf32> to vector<16x128xf32>
    %14 = arith.addf %11, %13 : vector<16x128xf32>
    %cst_11 = arith.constant 2.000000e-01 : f32
    %15 = vector.broadcast %cst_11 : f32 to vector<16x128xf32>
    %16 = arith.mulf %15, %14 : vector<16x128xf32>
    %17 = arith.maximumf %14, %16 : vector<16x128xf32>
    %18 = arith.truncf %17 : vector<16x128xf32> to vector<16x128xbf16>
    %c0_12 = arith.constant 0 : index
    %c0_13 = arith.constant 0 : index
    %19 = vector.load %arg4[%c0_12, %c0_13] : memref<128x128xbf16, #tpu.memory_space<vmem>>, vector<128x128xbf16>
    %cst_14 = arith.constant dense<0.000000e+00> : vector<16x128xf32>
    %20 = tpu.matmul %18, %19, %cst_14 {dimension_numbers = #tpu.dot_dimension_numbers<[1], [0], [0], [1], [0, 0, 1, 1], [], []>} : vector<16x128xbf16>, vector<128x128xbf16>, vector<16x128xf32> -> vector<16x128xf32>
    %c0_15 = arith.constant 0 : index
    %c0_16 = arith.constant 0 : index
    %21 = vector.load %arg12[%c0_15, %c0_16] : memref<1x128xf32, #tpu.memory_space<vmem>>, vector<1x128xf32>
    %22 = vector.broadcast %21 : vector<1x128xf32> to vector<16x128xf32>
    %23 = arith.addf %20, %22 : vector<16x128xf32>
    %cst_17 = arith.constant 2.000000e-01 : f32
    %24 = vector.broadcast %cst_17 : f32 to vector<16x128xf32>
    %25 = arith.mulf %24, %23 : vector<16x128xf32>
    %26 = arith.maximumf %23, %25 : vector<16x128xf32>
    %27 = arith.truncf %26 : vector<16x128xf32> to vector<16x128xbf16>
    %c0_18 = arith.constant 0 : index
    %c0_19 = arith.constant 0 : index
    %28 = vector.load %arg5[%c0_18, %c0_19] : memref<128x128xbf16, #tpu.memory_space<vmem>>, vector<128x128xbf16>
    %cst_20 = arith.constant dense<0.000000e+00> : vector<16x128xf32>
    %29 = tpu.matmul %27, %28, %cst_20 {dimension_numbers = #tpu.dot_dimension_numbers<[1], [0], [0], [1], [0, 0, 1, 1], [], []>} : vector<16x128xbf16>, vector<128x128xbf16>, vector<16x128xf32> -> vector<16x128xf32>
    %c0_21 = arith.constant 0 : index
    %c0_22 = arith.constant 0 : index
    %30 = vector.load %arg13[%c0_21, %c0_22] : memref<1x128xf32, #tpu.memory_space<vmem>>, vector<1x128xf32>
    %31 = vector.broadcast %30 : vector<1x128xf32> to vector<16x128xf32>
    %32 = arith.addf %29, %31 : vector<16x128xf32>
    %cst_23 = arith.constant 2.000000e-01 : f32
    %33 = vector.broadcast %cst_23 : f32 to vector<16x128xf32>
    %34 = arith.mulf %33, %32 : vector<16x128xf32>
    %35 = arith.maximumf %32, %34 : vector<16x128xf32>
    %36 = arith.truncf %35 : vector<16x128xf32> to vector<16x128xbf16>
    %c0_24 = arith.constant 0 : index
    %c0_25 = arith.constant 0 : index
    %37 = vector.load %arg6[%c0_24, %c0_25] : memref<128x128xbf16, #tpu.memory_space<vmem>>, vector<128x128xbf16>
    %cst_26 = arith.constant dense<0.000000e+00> : vector<16x128xf32>
    %38 = tpu.matmul %36, %37, %cst_26 {dimension_numbers = #tpu.dot_dimension_numbers<[1], [0], [0], [1], [0, 0, 1, 1], [], []>} : vector<16x128xbf16>, vector<128x128xbf16>, vector<16x128xf32> -> vector<16x128xf32>
    %c0_27 = arith.constant 0 : index
    %c0_28 = arith.constant 0 : index
    %39 = vector.load %arg14[%c0_27, %c0_28] : memref<1x128xf32, #tpu.memory_space<vmem>>, vector<1x128xf32>
    %40 = vector.broadcast %39 : vector<1x128xf32> to vector<16x128xf32>
    %41 = arith.addf %38, %40 : vector<16x128xf32>
    %cst_29 = arith.constant 2.000000e-01 : f32
    %42 = vector.broadcast %cst_29 : f32 to vector<16x128xf32>
    %43 = arith.mulf %42, %41 : vector<16x128xf32>
    %44 = arith.maximumf %41, %43 : vector<16x128xf32>
    %45 = arith.truncf %44 : vector<16x128xf32> to vector<16x128xbf16>
    %c0_30 = arith.constant 0 : index
    %c0_31 = arith.constant 0 : index
    %46 = vector.load %arg7[%c0_30, %c0_31] : memref<128x128xbf16, #tpu.memory_space<vmem>>, vector<128x128xbf16>
    %cst_32 = arith.constant dense<0.000000e+00> : vector<16x128xf32>
    %47 = tpu.matmul %45, %46, %cst_32 {dimension_numbers = #tpu.dot_dimension_numbers<[1], [0], [0], [1], [0, 0, 1, 1], [], []>} : vector<16x128xbf16>, vector<128x128xbf16>, vector<16x128xf32> -> vector<16x128xf32>
    %c0_33 = arith.constant 0 : index
    %c0_34 = arith.constant 0 : index
    %48 = vector.load %arg15[%c0_33, %c0_34] : memref<1x128xf32, #tpu.memory_space<vmem>>, vector<1x128xf32>
    %49 = vector.broadcast %48 : vector<1x128xf32> to vector<16x128xf32>
    %50 = arith.addf %47, %49 : vector<16x128xf32>
    %cst_35 = arith.constant 2.000000e-01 : f32
    %51 = vector.broadcast %cst_35 : f32 to vector<16x128xf32>
    %52 = arith.mulf %51, %50 : vector<16x128xf32>
    %53 = arith.maximumf %50, %52 : vector<16x128xf32>
    %54 = arith.truncf %53 : vector<16x128xf32> to vector<16x128xbf16>
    %c0_36 = arith.constant 0 : index
    %c0_37 = arith.constant 0 : index
    %55 = vector.load %arg8[%c0_36, %c0_37] : memref<128x128xbf16, #tpu.memory_space<vmem>>, vector<128x128xbf16>
    %cst_38 = arith.constant dense<0.000000e+00> : vector<16x128xf32>
    %56 = tpu.matmul %54, %55, %cst_38 {dimension_numbers = #tpu.dot_dimension_numbers<[1], [0], [0], [1], [0, 0, 1, 1], [], []>} : vector<16x128xbf16>, vector<128x128xbf16>, vector<16x128xf32> -> vector<16x128xf32>
    %c0_39 = arith.constant 0 : index
    %c0_40 = arith.constant 0 : index
    %57 = vector.load %arg16[%c0_39, %c0_40] : memref<1x128xf32, #tpu.memory_space<vmem>>, vector<1x128xf32>
    %58 = vector.broadcast %57 : vector<1x128xf32> to vector<16x128xf32>
    %59 = arith.addf %56, %58 : vector<16x128xf32>
    %cst_41 = arith.constant 2.000000e-01 : f32
    %60 = vector.broadcast %cst_41 : f32 to vector<16x128xf32>
    %61 = arith.mulf %60, %59 : vector<16x128xf32>
    %62 = arith.maximumf %59, %61 : vector<16x128xf32>
    %63 = arith.truncf %62 : vector<16x128xf32> to vector<16x128xbf16>
    %c0_42 = arith.constant 0 : index
    %c0_43 = arith.constant 0 : index
    %64 = vector.load %arg9[%c0_42, %c0_43] : memref<128x128xbf16, #tpu.memory_space<vmem>>, vector<128x128xbf16>
    %cst_44 = arith.constant dense<0.000000e+00> : vector<16x128xf32>
    %65 = tpu.matmul %63, %64, %cst_44 {dimension_numbers = #tpu.dot_dimension_numbers<[1], [0], [0], [1], [0, 0, 1, 1], [], []>} : vector<16x128xbf16>, vector<128x128xbf16>, vector<16x128xf32> -> vector<16x128xf32>
    %c0_45 = arith.constant 0 : index
    %c0_46 = arith.constant 0 : index
    %66 = vector.load %arg17[%c0_45, %c0_46] : memref<1x128xf32, #tpu.memory_space<vmem>>, vector<1x128xf32>
    %67 = vector.broadcast %66 : vector<1x128xf32> to vector<16x128xf32>
    %68 = arith.addf %65, %67 : vector<16x128xf32>
    %c0_47 = arith.constant 0 : index
    %c0_48 = arith.constant 0 : index
    %69 = vector.load %arg18[%c0_47, %c0_48] : memref<16x128xf32, #tpu.memory_space<vmem>>, vector<16x128xf32>
    tpu.vector_store %arg18[%c0_47, %c0_48], %68 {strides = array<i32>} : memref<16x128xf32, #tpu.memory_space<vmem>>, vector<16x128xf32>,
    return
  }
  func.func @transform_0(%arg0: i32) -> (i32, i32) {
    %c0_i32 = arith.constant 0 : i32
    %c0_i32_0 = arith.constant 0 : i32
    return %arg0, %c0_i32 : i32, i32
  }
  func.func @transform_1(%arg0: i32) -> (i32, i32) {
    %c0_i32 = arith.constant 0 : i32
    %c0_i32_0 = arith.constant 0 : i32
    %c0_i32_1 = arith.constant 0 : i32
    return %c0_i32, %c0_i32_0 : i32, i32
  }
  func.func @transform_2(%arg0: i32) -> (i32, i32) {
    %c0_i32 = arith.constant 0 : i32
    %c0_i32_0 = arith.constant 0 : i32
    %c0_i32_1 = arith.constant 0 : i32
    return %c0_i32, %c0_i32_0 : i32, i32
  }
  func.func @transform_3(%arg0: i32) -> (i32, i32) {
    %c0_i32 = arith.constant 0 : i32
    %c0_i32_0 = arith.constant 0 : i32
    %c0_i32_1 = arith.constant 0 : i32
    return %c0_i32, %c0_i32_0 : i32, i32
  }
  func.func @transform_4(%arg0: i32) -> (i32, i32) {
    %c0_i32 = arith.constant 0 : i32
    %c0_i32_0 = arith.constant 0 : i32
    %c0_i32_1 = arith.constant 0 : i32
    return %c0_i32, %c0_i32_0 : i32, i32
  }
  func.func @transform_5(%arg0: i32) -> (i32, i32) {
    %c0_i32 = arith.constant 0 : i32
    %c0_i32_0 = arith.constant 0 : i32
    %c0_i32_1 = arith.constant 0 : i32
    return %c0_i32, %c0_i32_0 : i32, i32
  }
  func.func @transform_6(%arg0: i32) -> (i32, i32) {
    %c0_i32 = arith.constant 0 : i32
    %c0_i32_0 = arith.constant 0 : i32
    %c0_i32_1 = arith.constant 0 : i32
    return %c0_i32, %c0_i32_0 : i32, i32
  }
  func.func @transform_7(%arg0: i32) -> (i32, i32) {
    %c0_i32 = arith.constant 0 : i32
    %c0_i32_0 = arith.constant 0 : i32
    %c0_i32_1 = arith.constant 0 : i32
    return %c0_i32, %c0_i32_0 : i32, i32
  }
  func.func @transform_8(%arg0: i32) -> (i32, i32) {
    %c0_i32 = arith.constant 0 : i32
    %c0_i32_0 = arith.constant 0 : i32
    %c0_i32_1 = arith.constant 0 : i32
    return %c0_i32, %c0_i32_0 : i32, i32
  }
  func.func @transform_9(%arg0: i32) -> (i32, i32) {
    %c0_i32 = arith.constant 0 : i32
    %c0_i32_0 = arith.constant 0 : i32
    %c0_i32_1 = arith.constant 0 : i32
    return %c0_i32, %c0_i32_0 : i32, i32
  }
  func.func @transform_10(%arg0: i32) -> (i32, i32) {
    %c0_i32 = arith.constant 0 : i32
    %c0_i32_0 = arith.constant 0 : i32
    %c0_i32_1 = arith.constant 0 : i32
    return %c0_i32, %c0_i32_0 : i32, i32
  }
  func.func @transform_11(%arg0: i32) -> (i32, i32) {
    %c0_i32 = arith.constant 0 : i32
    %c0_i32_0 = arith.constant 0 : i32
    %c0_i32_1 = arith.constant 0 : i32
    return %c0_i32, %c0_i32_0 : i32, i32
  }
  func.func @transform_12(%arg0: i32) -> (i32, i32) {
    %c0_i32 = arith.constant 0 : i32
    %c0_i32_0 = arith.constant 0 : i32
    %c0_i32_1 = arith.constant 0 : i32
    return %c0_i32, %c0_i32_0 : i32, i32
  }
  func.func @transform_13(%arg0: i32) -> (i32, i32) {
    %c0_i32 = arith.constant 0 : i32
    %c0_i32_0 = arith.constant 0 : i32
    %c0_i32_1 = arith.constant 0 : i32
    return %c0_i32, %c0_i32_0 : i32, i32
  }
  func.func @transform_14(%arg0: i32) -> (i32, i32) {
    %c0_i32 = arith.constant 0 : i32
    %c0_i32_0 = arith.constant 0 : i32
    %c0_i32_1 = arith.constant 0 : i32
    return %c0_i32, %c0_i32_0 : i32, i32
  }
  func.func @transform_15(%arg0: i32) -> (i32, i32) {
    %c0_i32 = arith.constant 0 : i32
    %c0_i32_0 = arith.constant 0 : i32
    %c0_i32_1 = arith.constant 0 : i32
    return %c0_i32, %c0_i32_0 : i32, i32
  }
  func.func @transform_16(%arg0: i32) -> (i32, i32) {
    %c0_i32 = arith.constant 0 : i32
    %c0_i32_0 = arith.constant 0 : i32
    %c0_i32_1 = arith.constant 0 : i32
    return %c0_i32, %c0_i32_0 : i32, i32
  }
  func.func @transform_17(%arg0: i32) -> (i32, i32) {
    %c0_i32 = arith.constant 0 : i32
    %c0_i32_0 = arith.constant 0 : i32
    return %arg0, %c0_i32 : i32, i32
  }
}

</mosaic_0001>

<bundles_post_ra>
// kernel: tpu_custom_call.1
= control target key start
LH: loop header
LB: loop body
LE: loop exit
PB: predicated region body
PF: predicated region fallthrough
CT: control target
= control target key end

     0   :  { %s2145_s0 = inlined_call_operand.hbm [shape: bf16[16,128], index: 0, kind: input, shape index: {}]   ;;  %s2146_s1 = inlined_call_operand.hbm [shape: bf16[128,128], index: 1, kind: input, shape index: {}]   ;;  %s2147_s2 = inlined_call_operand.hbm [shape: bf16[128,128], index: 2, kind: input, shape index: {}]   ;;  %s2148_s3 = inlined_call_operand.hbm [shape: bf16[128,128], index: 3, kind: input, shape index: {}]   ;;  %s2149_s4 = inlined_call_operand.hbm [shape: bf16[128,128], index: 4, kind: input, shape index: {}]   ;;  %s2150_s5 = inlined_call_operand.hbm [shape: bf16[128,128], index: 5, kind: input, shape index: {}]   ;;  %s2151_s6 = inlined_call_operand.hbm [shape: bf16[128,128], index: 6, kind: input, shape index: {}]   ;;  %s2152_s7 = inlined_call_operand.hbm [shape: bf16[128,128], index: 7, kind: input, shape index: {}]   ;;  %s2153_s8 = inlined_call_operand.hbm [shape: bf16[128,128], index: 8, kind: input, shape index: {}]   ;;  %s2154_s9 = inlined_call_operand.vmem [shape: f32[1,128], index: 9, kind: input, shape index: {}]   ;;  %s2155_s10 = inlined_call_operand.vmem [shape: f32[1,128], index: 10, kind: input, shape index: {}]   ;;  %s2156_s11 = inlined_call_operand.vmem [shape: f32[1,128], index: 11, kind: input, shape index: {}]   ;;  %s2157_s12 = inlined_call_operand.vmem [shape: f32[1,128], index: 12, kind: input, shape index: {}]   ;;  %s2158_s13 = inlined_call_operand.vmem [shape: f32[1,128], index: 13, kind: input, shape index: {}]   ;;  %s2159_s14 = inlined_call_operand.vmem [shape: f32[1,128], index: 14, kind: input, shape index: {}]   ;;  %s2160_s15 = inlined_call_operand.vmem [shape: f32[1,128], index: 15, kind: input, shape index: {}]   ;;  %s2161_s16 = inlined_call_operand.vmem [shape: f32[1,128], index: 16, kind: input, shape index: {}]   ;;  %s2162_s17 = inlined_call_operand.hbm [shape: f32[16,128], index: 17, kind: output, shape index: {}]  }
   0x1   :  { %2166 = sst [smem:[#allocation24_spill]] %s2145_s0 }
   0x2   :  { %2167 = sst [smem:[#allocation25_spill]] %s2146_s1 }
   0x3   :  { %2168 = sst [smem:[#allocation26_spill]] %s2162_s17 }
   0x4   :  { %22 = vsyncpa [#allocation3], 0 }
   0x5   :  { %23 = vsyncpa [#allocation6], 0 }
   0x6   :  { %24 = vsyncpa [#allocation9], 0 }
   0x7   :  { %25 = vsyncpa [#allocation12], 0 }
   0x8   :  { %26 = vsyncpa [#allocation15], 0 }
   0x9   :  { %27 = vsyncpa [#allocation4], 0  ;;  %s1760_s24 = smov [#allocation5]   ;;  %s1761_s26 = smov [#allocation8]  }
   0xa   :  { %s45_s25 = sshll.u32 %s1760_s24, 4  ;;  %s69_s27 = sshll.u32 %s1761_s26, 4  ;;  %s46_s25 = int_to_ptr.vmem [resolvable:$true] %s45_s25  ;;  %s1866_s27 = int_to_ptr.vmem [resolvable:$true] %s69_s27 }
   0xb   :  { %s2169_s0 = sld [smem:[#allocation25_spill]] }
  0x11   :  { %s1528_s30 = scalar_lea.hbm %s2169_s0, 1024 }
  0x12   :  { %p1529_p0 = scmp.ne.s32.totalorder %s2169_s0, %s1528_s30  ;;  %p1532_p1 = scmp.lt.u32.totalorder %s1528_s30, %s2169_s0 }
  0x14   :  { %p1534_p2 = pnand %p1532_p1, %p1529_p0 }
  0x16   :  { %1537 = shalt.err (!%p1534_p2)
}
  0x17   :  { %s1538_s21 = scalar_lea.vmem %s46_s25, 1024  ;;  %p1543_p4 = scmp.lt.s32.totalorder %s46_s25, %s46_s25 }
  0x18   :  { %p1539_p3 = scmp.ne.s32.totalorder %s46_s25, %s1538_s21  ;;  %p1544_p5 = scmp.lt.s32.totalorder %s1538_s21, %s1538_s21 }
  0x1a   :  { %p1545_p6 = por %p1544_p5, %p1543_p4 }
  0x1c   :  { %p1546_p7 = pnand %p1545_p6, %p1539_p3 }
  0x1e   :  { %1549 = shalt.err (!%p1546_p7)
}
  0x1f   :  { %s1762_s22 = smov 64   ;;  %s1763_s23 = smov 4  }
  0x20   :  { %51 = dma.hbm_to_vmem [thread:$0]  %s2169_s0, 1024, %s46_s25, [#allocation6], %s1762_s22, %s1762_s22, %s1763_s23  }
  0x21   :  { %s1550_s30 = scalar_lea.hbm %s2148_s3, 1024 }
  0x22   :  { %p1551_p8 = scmp.ne.s32.totalorder %s2148_s3, %s1550_s30  ;;  %p1554_p9 = scmp.lt.u32.totalorder %s1550_s30, %s2148_s3 }
  0x24   :  { %p1556_p10 = pnand %p1554_p9, %p1551_p8 }
  0x26   :  { %1559 = shalt.err (!%p1556_p10)
}
  0x27   :  { %s1560_s21 = scalar_lea.vmem %s1866_s27, 1024  ;;  %p1565_p12 = scmp.lt.s32.totalorder %s1866_s27, %s1866_s27 }
  0x28   :  { %p1561_p11 = scmp.ne.s32.totalorder %s1866_s27, %s1560_s21  ;;  %p1566_p13 = scmp.lt.s32.totalorder %s1560_s21, %s1560_s21 }
  0x2a   :  { %p1567_p0 = por %p1566_p13, %p1565_p12 }
  0x2c   :  { %p1568_p1 = pnand %p1567_p0, %p1561_p11 }
  0x2e   :  { %1571 = shalt.err (!%p1568_p1)
}
  0x2f   :  { %75 = dma.hbm_to_vmem [thread:$0]  %s2148_s3, 1024, %s1866_s27, [#allocation9], %s1762_s22, %s1762_s22, %s1763_s23  }
  0x30   :  { %s1764_s24 = smov [#allocation11]   ;;  %s1765_s28 = smov [#allocation14]  }
  0x31   :  { %s93_s26 = sshll.u32 %s1764_s24, 4  ;;  %s117_s29 = sshll.u32 %s1765_s28, 4  ;;  %s94_s26 = int_to_ptr.vmem [resolvable:$true] %s93_s26  ;;  %s1903_s29 = int_to_ptr.vmem [resolvable:$true] %s117_s29 }
  0x32   :  { %s1572_s19 = scalar_lea.hbm %s2150_s5, 1024 }
  0x33   :  { %p1573_p2 = scmp.ne.s32.totalorder %s2150_s5, %s1572_s19  ;;  %p1576_p3 = scmp.lt.u32.totalorder %s1572_s19, %s2150_s5 }
  0x35   :  { %p1578_p4 = pnand %p1576_p3, %p1573_p2 }
  0x37   :  { %1581 = shalt.err (!%p1578_p4)
}
  0x38   :  { %s1582_s3 = scalar_lea.vmem %s94_s26, 1024  ;;  %p1587_p6 = scmp.lt.s32.totalorder %s94_s26, %s94_s26 }
  0x39   :  { %p1583_p5 = scmp.ne.s32.totalorder %s94_s26, %s1582_s3  ;;  %p1588_p7 = scmp.lt.s32.totalorder %s1582_s3, %s1582_s3 }
  0x3b   :  { %p1589_p8 = por %p1588_p7, %p1587_p6 }
  0x3d   :  { %p1590_p9 = pnand %p1589_p8, %p1583_p5 }
  0x3f   :  { %1593 = shalt.err (!%p1590_p9)
}
  0x40   :  { %99 = dma.hbm_to_vmem [thread:$0]  %s2150_s5, 1024, %s94_s26, [#allocation12], %s1762_s22, %s1762_s22, %s1763_s23  }
  0x41   :  { %s1594_s17 = scalar_lea.hbm %s2152_s7, 1024 }
  0x42   :  { %p1595_p10 = scmp.ne.s32.totalorder %s2152_s7, %s1594_s17  ;;  %p1598_p11 = scmp.lt.u32.totalorder %s1594_s17, %s2152_s7 }
  0x44   :  { %p1600_p12 = pnand %p1598_p11, %p1595_p10 }
  0x46   :  { %1603 = shalt.err (!%p1600_p12)
}
  0x47   :  { %s1604_s1 = scalar_lea.vmem %s1903_s29, 1024  ;;  %p1609_p0 = scmp.lt.s32.totalorder %s1903_s29, %s1903_s29 }
  0x48   :  { %p1605_p13 = scmp.ne.s32.totalorder %s1903_s29, %s1604_s1  ;;  %p1610_p1 = scmp.lt.s32.totalorder %s1604_s1, %s1604_s1 }
  0x4a   :  { %p1611_p2 = por %p1610_p1, %p1609_p0 }
  0x4c   :  { %p1612_p3 = pnand %p1611_p2, %p1605_p13 }
  0x4e   :  { %1615 = shalt.err (!%p1612_p3)
}
  0x4f   :  { %123 = dma.hbm_to_vmem [thread:$0]  %s2152_s7, 1024, %s1903_s29, [#allocation15], %s1762_s22, %s1762_s22, %s1763_s23  }
  0x50   :  { %s1766_s20 = smov [#allocation2]   ;;  %s1767_s3 = smov [#allocation7]  }
  0x51   :  { %s33_s21 = sshll.u32 %s1766_s20, 4  ;;  %s57_s27 = sshll.u32 %s1767_s3, 4  ;;  %s34_s21 = int_to_ptr.vmem [resolvable:$true] %s33_s21  ;;  %s1940_s27 = int_to_ptr.vmem [resolvable:$true] %s57_s27 }
  0x52   :  { %s2170_s24 = sld [smem:[#allocation24_spill]] }
  0x58   :  { %s1616_s17 = scalar_lea.hbm %s2170_s24, 128 }
  0x59   :  { %p1617_p4 = scmp.ne.s32.totalorder %s2170_s24, %s1616_s17  ;;  %p1620_p5 = scmp.lt.u32.totalorder %s1616_s17, %s2170_s24 }
  0x5b   :  { %p1622_p6 = pnand %p1620_p5, %p1617_p4 }
  0x5d   :  { %1625 = shalt.err (!%p1622_p6)
}
  0x5e   :  { %s1626_s7 = scalar_lea.vmem %s34_s21, 128  ;;  %p1631_p8 = scmp.lt.s32.totalorder %s34_s21, %s34_s21 }
  0x5f   :  { %p1627_p7 = scmp.ne.s32.totalorder %s34_s21, %s1626_s7  ;;  %p1632_p9 = scmp.lt.s32.totalorder %s1626_s7, %s1626_s7 }
  0x61   :  { %p1633_p10 = por %p1632_p9, %p1631_p8 }
  0x63   :  { %p1634_p11 = pnand %p1633_p10, %p1627_p7 }
  0x65   :  { %1637 = shalt.err (!%p1634_p11)
}
  0x66   :  { %39 = dma.hbm_to_vmem [thread:$0]  %s2170_s24, 128, %s34_s21, [#allocation3], %s1762_s22, %s1762_s22, %s1763_s23  }
  0x67   :  { %s1638_s20 = scalar_lea.hbm %s2147_s2, 1024 }
  0x68   :  { %p1639_p12 = scmp.ne.s32.totalorder %s2147_s2, %s1638_s20  ;;  %p1642_p13 = scmp.lt.u32.totalorder %s1638_s20, %s2147_s2 }
  0x6a   :  { %p1644_p0 = pnand %p1642_p13, %p1639_p12 }
  0x6c   :  { %1647 = shalt.err (!%p1644_p0)
}
  0x6d   :  { %s1648_s28 = scalar_lea.vmem %s1940_s27, 1024  ;;  %p1653_p2 = scmp.lt.s32.totalorder %s1940_s27, %s1940_s27 }
  0x6e   :  { %p1649_p1 = scmp.ne.s32.totalorder %s1940_s27, %s1648_s28  ;;  %p1654_p3 = scmp.lt.s32.totalorder %s1648_s28, %s1648_s28 }
  0x70   :  { %p1655_p4 = por %p1654_p3, %p1653_p2 }
  0x72   :  { %p1656_p5 = pnand %p1655_p4, %p1649_p1 }
  0x74   :  { %1659 = shalt.err (!%p1656_p5)
}
  0x75   :  { %63 = dma.hbm_to_vmem [thread:$0]  %s2147_s2, 1024, %s1940_s27, [#allocation6], %s1762_s22, %s1762_s22, %s1763_s23  }
  0x76   :  { %s1768_s30 = smov [#allocation10]   ;;  %s1769_s19 = smov [#allocation13]  }
  0x77   :  { %s81_s18 = sshll.u32 %s1768_s30, 4  ;;  %s105_s7 = sshll.u32 %s1769_s19, 4  ;;  %s82_s18 = int_to_ptr.vmem [resolvable:$true] %s81_s18  ;;  %s1977_s7 = int_to_ptr.vmem [resolvable:$true] %s105_s7 }
  0x78   :  { %s1660_s5 = scalar_lea.hbm %s2149_s4, 1024 }
  0x79   :  { %p1661_p6 = scmp.ne.s32.totalorder %s2149_s4, %s1660_s5  ;;  %p1664_p7 = scmp.lt.u32.totalorder %s1660_s5, %s2149_s4 }
  0x7b   :  { %p1666_p8 = pnand %p1664_p7, %p1661_p6 }
  0x7d   :  { %1669 = shalt.err (!%p1666_p8)
}
  0x7e   :  { %s1670_s2 = scalar_lea.vmem %s82_s18, 1024  ;;  %p1675_p10 = scmp.lt.s32.totalorder %s82_s18, %s82_s18 }
  0x7f   :  { %p1671_p9 = scmp.ne.s32.totalorder %s82_s18, %s1670_s2  ;;  %p1676_p11 = scmp.lt.s32.totalorder %s1670_s2, %s1670_s2 }
  0x81   :  { %p1677_p12 = por %p1676_p11, %p1675_p10 }
  0x83   :  { %p1678_p13 = pnand %p1677_p12, %p1671_p9 }
  0x85   :  { %1681 = shalt.err (!%p1678_p13)
}
  0x86   :  { %87 = dma.hbm_to_vmem [thread:$0]  %s2149_s4, 1024, %s82_s18, [#allocation9], %s1762_s22, %s1762_s22, %s1763_s23  }
  0x87   :  { %s1682_s21 = scalar_lea.hbm %s2151_s6, 1024 }
  0x88   :  { %p1683_p0 = scmp.ne.s32.totalorder %s2151_s6, %s1682_s21  ;;  %p1686_p1 = scmp.lt.u32.totalorder %s1682_s21, %s2151_s6 }
  0x8a   :  { %p1688_p2 = pnand %p1686_p1, %p1683_p0 }
  0x8c   :  { %1691 = shalt.err (!%p1688_p2)
}
  0x8d   :  { %s1692_s1 = scalar_lea.vmem %s1977_s7, 1024  ;;  %p1697_p4 = scmp.lt.s32.totalorder %s1977_s7, %s1977_s7 }
  0x8e   :  { %p1693_p3 = scmp.ne.s32.totalorder %s1977_s7, %s1692_s1  ;;  %p1698_p5 = scmp.lt.s32.totalorder %s1692_s1, %s1692_s1 }
  0x90   :  { %p1699_p6 = por %p1698_p5, %p1697_p4 }
  0x92   :  { %p1700_p7 = pnand %p1699_p6, %p1693_p3 }
  0x94   :  { %1703 = shalt.err (!%p1700_p7)
}
  0x95   :  { %111 = dma.hbm_to_vmem [thread:$0]  %s2151_s6, 1024, %s1977_s7, [#allocation12], %s1762_s22, %s1762_s22, %s1763_s23  }
  0x96   :  { %s1770_s5 = smov [#allocation16]   ;;  %s1704_s25 = scalar_lea.hbm %s2153_s8, 1024 }
  0x97   :  { %s129_s26 = sshll.u32 %s1770_s5, 4  ;;  %p1705_p8 = scmp.ne.s32.totalorder %s2153_s8, %s1704_s25  ;;  %s130_s26 = int_to_ptr.vmem [resolvable:$true] %s129_s26 }
  0x98   :  { %p1708_p9 = scmp.lt.u32.totalorder %s1704_s25, %s2153_s8 }
  0x9a   :  { %p1710_p10 = pnand %p1708_p9, %p1705_p8 }
  0x9c   :  { %1713 = shalt.err (!%p1710_p10)
}
  0x9d   :  { %s1714_s28 = scalar_lea.vmem %s130_s26, 1024  ;;  %p1719_p12 = scmp.lt.s32.totalorder %s130_s26, %s130_s26 }
  0x9e   :  { %p1715_p11 = scmp.ne.s32.totalorder %s130_s26, %s1714_s28  ;;  %p1720_p13 = scmp.lt.s32.totalorder %s1714_s28, %s1714_s28 }
  0xa0   :  { %p1721_p0 = por %p1720_p13, %p1719_p12 }
  0xa2   :  { %p1722_p1 = pnand %p1721_p0, %p1715_p11 }
  0xa4   :  { %1725 = shalt.err (!%p1722_p1)
}
  0xa5   :  { %135 = dma.hbm_to_vmem [thread:$0]  %s2153_s8, 1024, %s130_s26, [#allocation15], %s1762_s22, %s1762_s22, %s1763_s23  }
  0xa6   :  { %1748 = dma.done.wait [#allocation3], 128  }
  0xa7   :  { %1749 = vsyncadd [#allocation3], 4294967168 }
  0xa8   :  { %1750 = dma.done.wait [#allocation6], 2048  }
  0xa9   :  { %1751 = vsyncadd [#allocation6], 4294965248 }
  0xaa   :  { %1752 = dma.done.wait [#allocation9], 2048  }
  0xab   :  { %1753 = vsyncadd [#allocation9], 4294965248 }
  0xac   :  { %1754 = dma.done.wait [#allocation12], 2048  }
  0xad   :  { %1755 = vsyncadd [#allocation12], 4294965248 }
  0xae   :  { %1756 = dma.done.wait [#allocation15], 2048  }
  0xaf   :  { %1757 = vsyncadd [#allocation15], 4294965248  ;;  %v1771_v0 = vmov 0.0   ;;  %vm1772_vm0 = vmmov 0   ;;  %v1463_v1 = vld [vmem:[#allocation5] sm:$0xff]   ;;  %v1464_v2 = vld [vmem:[#allocation5 + $0x8] sm:$0xff]  }
  0xb0   :  { %1287 = vmatprep.subr.bf16.mxu0 %v1771_v0  ;;  %1303 = vmatprep.mubr.msk.bf16.mxu0 %vm1772_vm0, %v1771_v0  ;;  %v1465_v3 = vld [vmem:[#allocation5 + $0x10] sm:$0xff]   ;;  %v1472_v4 = vld [vmem:[#allocation7] sm:$0xff]   ;;  %v1466_v5 = vld [vmem:[#allocation5 + $0x18] sm:$0xff]   ;;  %s1773_s18 = smov [#allocation17]  }
  0xb1   :  { %1307 = vmatprep.subr.bf16.mxu1 %v1771_v0  ;;  %1323 = vmatprep.mubr.msk.bf16.mxu1 %vm1772_vm0, %v1771_v0  ;;  %v1473_v6 = vld [vmem:[#allocation7 + $0x8] sm:$0xff]   ;;  %v1467_v7 = vld [vmem:[#allocation5 + $0x20] sm:$0xff]   ;;  %v1474_v8 = vld [vmem:[#allocation7 + $0x10] sm:$0xff]   ;;  %s1126_s5 = sshll.u32 %s1773_s18, 4  ;;  %s1127_s5 = int_to_ptr.vmem [resolvable:$true] %s1126_s5 }
  0xb2   :  { %1288 = vmatpush3.bf16.msra.mxu0 %v1463_v1  ;;  %1308 = vmatpush3.bf16.msra.mxu1 %v1472_v4  ;;  %v1468_v9 = vld [vmem:[#allocation5 + $0x28] sm:$0xff]   ;;  %v1475_v10 = vld [vmem:[#allocation7 + $0x18] sm:$0xff]   ;;  %v1469_v11 = vld [vmem:[#allocation5 + $0x30] sm:$0xff]   ;;  %p1731_p3 = scmp.lt.s32.totalorder %s1127_s5, %s1127_s5 }
  0xb3   :  { %1289 = vmatprep.subr.bf16.mxu0 %v1771_v0  ;;  %1309 = vmatprep.subr.bf16.mxu1 %v1771_v0  ;;  %v1476_v12 = vld [vmem:[#allocation7 + $0x20] sm:$0xff]   ;;  %v1470_v13 = vld [vmem:[#allocation5 + $0x38] sm:$0xff]   ;;  %v1477_v15 = vld [vmem:[#allocation7 + $0x28] sm:$0xff]  }
  0xb4   :  { %v1471_v14 = vld [vmem:[#allocation2] sm:$0xff]   ;;  %v1478_v16 = vld [vmem:[#allocation7 + $0x30] sm:$0xff]   ;;  %v1480_v18 = vld [vmem:[#allocation8] sm:$0xff]  }
  0xb5   :  { %v1479_v17 = vld [vmem:[#allocation7 + $0x38] sm:$0xff]   ;;  %v1481_v19 = vld [vmem:[#allocation8 + $0x8] sm:$0xff]   ;;  %v1482_v20 = vld [vmem:[#allocation8 + $0x10] sm:$0xff]  }
  0xb6   :  { %1290 = vmatpush3.bf16.msra.mxu0 %v1464_v2  ;;  %1310 = vmatpush3.bf16.msra.mxu1 %v1473_v6  ;;  %v1483_v21 = vld [vmem:[#allocation8 + $0x18] sm:$0xff]   ;;  %v1484_v22 = vld [vmem:[#allocation8 + $0x20] sm:$0xff]   ;;  %v1485_v35 = vld [vmem:[#allocation8 + $0x28] sm:$0xff]  }
  0xb7   :  { %1291 = vmatprep.subr.bf16.mxu0 %v1771_v0  ;;  %1311 = vmatprep.subr.bf16.mxu1 %v1771_v0  ;;  %v1142_v23 = vld [vmem:[%s2154_s9] ss:$0 sm:$0xff]  ;;  %v1486_v36 = vld [vmem:[#allocation8 + $0x30] sm:$0xff]   ;;  %v1488_v38 = vld [vmem:[#allocation10] sm:$0xff]  }
  0xb8   :  { %v1487_v37 = vld [vmem:[#allocation8 + $0x38] sm:$0xff]   ;;  %v1489_v39 = vld [vmem:[#allocation10 + $0x8] sm:$0xff]   ;;  %v1490_v40 = vld [vmem:[#allocation10 + $0x10] sm:$0xff]  }
  0xb9   :  { %v1491_v41 = vld [vmem:[#allocation10 + $0x18] sm:$0xff]   ;;  %v1492_v42 = vld [vmem:[#allocation10 + $0x20] sm:$0xff]   ;;  %v1493_v55 = vld [vmem:[#allocation10 + $0x28] sm:$0xff]  }
  0xba   :  { %1292 = vmatpush3.bf16.msra.mxu0 %v1465_v3  ;;  %1312 = vmatpush3.bf16.msra.mxu1 %v1474_v8  ;;  %v1152_v43 = vld [vmem:[%s2155_s10] ss:$0 sm:$0xff]  ;;  %v1494_v56 = vld [vmem:[#allocation10 + $0x30] sm:$0xff]   ;;  %v1496_v58 = vld [vmem:[#allocation11] sm:$0xff]  }
  0xbb   :  { %1293 = vmatprep.subr.bf16.mxu0 %v1771_v0  ;;  %1313 = vmatprep.subr.bf16.mxu1 %v1771_v0  ;;  %v1495_v57 = vld [vmem:[#allocation10 + $0x38] sm:$0xff]   ;;  %v1497_v59 = vld [vmem:[#allocation11 + $0x8] sm:$0xff]   ;;  %v1498_v60 = vld [vmem:[#allocation11 + $0x10] sm:$0xff]  }
  0xbc   :  { %v1499_v61 = vld [vmem:[#allocation11 + $0x18] sm:$0xff]   ;;  %v1500_v62 = vld [vmem:[#allocation11 + $0x20] sm:$0xff]  }
  0xbd   :  { %v1161_v63 = vld [vmem:[%s2156_s11] ss:$0 sm:$0xff] }
  0xbe   :  { %1294 = vmatpush3.bf16.msra.mxu0 %v1466_v5  ;;  %1314 = vmatpush3.bf16.msra.mxu1 %v1475_v10 }
  0xbf   :  { %1295 = vmatprep.subr.bf16.mxu0 %v1771_v0  ;;  %1315 = vmatprep.subr.bf16.mxu1 %v1771_v0 }
  0xc2   :  { %1296 = vmatpush3.bf16.msra.mxu0 %v1467_v7  ;;  %1316 = vmatpush3.bf16.msra.mxu1 %v1476_v12  ;;  %v1501_v12 = vld [vmem:[#allocation11 + $0x28] sm:$0xff]  }
  0xc3   :  { %1297 = vmatprep.subr.bf16.mxu0 %v1771_v0  ;;  %1317 = vmatprep.subr.bf16.mxu1 %v1771_v0 }
  0xc6   :  { %1298 = vmatpush3.bf16.msra.mxu0 %v1468_v9  ;;  %1318 = vmatpush3.bf16.msra.mxu1 %v1477_v15  ;;  %v1504_v15 = vld [vmem:[#allocation13] sm:$0xff]  }
  0xc7   :  { %1299 = vmatprep.subr.bf16.mxu0 %v1771_v0  ;;  %1319 = vmatprep.subr.bf16.mxu1 %v1771_v0 }
  0xca   :  { %1300 = vmatpush3.bf16.msra.mxu0 %v1469_v11  ;;  %1320 = vmatpush3.bf16.msra.mxu1 %v1478_v16  ;;  %v1505_v16 = vld [vmem:[#allocation13 + $0x8] sm:$0xff]  }
  0xcb   :  { %1301 = vmatprep.subr.bf16.mxu0 %v1771_v0  ;;  %1321 = vmatprep.subr.bf16.mxu1 %v1771_v0 }
  0xce   :  { %1302 = vmatpush3.bf16.msra.mxu0 %v1470_v13  ;;  %1322 = vmatpush3.bf16.msra.mxu1 %v1479_v17  ;;  %v1502_v13 = vld [vmem:[#allocation11 + $0x30] sm:$0xff]  }
  0xcf   :  { %1327 = vmatprep.subr.bf16.mxu0 %v1771_v0  ;;  %1347 = vmatprep.subr.bf16.mxu1 %v1771_v0  ;;  %v1506_v17 = vld [vmem:[#allocation13 + $0x10] sm:$0xff]  }
  0xd1   :  { %1304 = vmatmul.mubr.bf16.vlgmr.msra.gmra.mrb[0].mxu0 %v1471_v14  ;;  %v1503_v14 = vld [vmem:[#allocation11 + $0x38] sm:$0xff]  }
  0xd2   :  { %1343 = vmatprep.mubr.msk.bf16.mxu0 %vm1772_vm0, %v1771_v0  ;;  %1328 = vmatpush3.bf16.msra.mxu0 %v1480_v18  ;;  %v1507_v18 = vld [vmem:[#allocation13 + $0x18] sm:$0xff]  }
  0xd3   :  { %1329 = vmatprep.subr.bf16.mxu0 %v1771_v0 }
  0xd6   :  { %1330 = vmatpush3.bf16.msra.mxu0 %v1481_v19  ;;  %v1508_v19 = vld [vmem:[#allocation13 + $0x20] sm:$0xff]  }
  0xd7   :  { %1331 = vmatprep.subr.bf16.mxu0 %v1771_v0 }
  0xda   :  { %1332 = vmatpush3.bf16.msra.mxu0 %v1482_v20  ;;  %v1170_v20 = vld [vmem:[%s2157_s12] ss:$0 sm:$0xff] }
  0xdb   :  { %1333 = vmatprep.subr.bf16.mxu0 %v1771_v0 }
  0xde   :  { %1334 = vmatpush3.bf16.msra.mxu0 %v1483_v21 }
  0xdf   :  { %1335 = vmatprep.subr.bf16.mxu0 %v1771_v0 }
  0xe2   :  { %1336 = vmatpush3.bf16.msra.mxu0 %v1484_v22 }
  0xe3   :  { %1337 = vmatprep.subr.bf16.mxu0 %v1771_v0 }
  0xe6   :  { %1338 = vmatpush3.bf16.msra.mxu0 %v1485_v35  ;;  %v1512_v35 = vld [vmem:[#allocation14] sm:$0xff]  }
  0xe7   :  { %1339 = vmatprep.subr.bf16.mxu0 %v1771_v0 }
  0xea   :  { %1340 = vmatpush3.bf16.msra.mxu0 %v1486_v36  ;;  %v1513_v36 = vld [vmem:[#allocation14 + $0x8] sm:$0xff]  }
  0xeb   :  { %1341 = vmatprep.subr.bf16.mxu0 %v1771_v0 }
  0xee   :  { %1342 = vmatpush3.bf16.msra.mxu0 %v1487_v37  ;;  %v1514_v37 = vld [vmem:[#allocation14 + $0x10] sm:$0xff]  }
  0xef   :  { %1367 = vmatprep.subr.bf16.mxu0 %v1771_v0 }
 0x1a4   :  { %v293_v24 = vpop.f32.mrb[0].mxu0 }
 0x1a5   :  { %v294_v25 = vadd.f32 %v1142_v23, %v293_v24  ;;  %v1305_v26 = vpop.f32.mrb[1].mxu0 }
 0x1a6   :  { %v296_v27 = vpop.f32.mrb[2].mxu0 }
 0x1a7   :  { %v300_v28 = vmul.f32 0.01, %v294_v25  ;;  %v297_v29 = vadd.f32 %v1142_v23, %v296_v27  ;;  %v1306_v30 = vpop.f32.mrb[3].mxu0 }
 0x1a9   :  { %v301_v31 = vmul.f32 0.01, %v297_v29  ;;  %v302_v32 = vmax.f32 %v294_v25, %v300_v28 }
 0x1ab   :  { %v303_v33 = vmax.f32 %v297_v29, %v301_v31 }
 0x1ad   :  { %v304_v34 = vpack.c.bf16 %v303_v33, %v302_v32  ;;  %v1509_v32 = vld [vmem:[#allocation13 + $0x28] sm:$0xff]   ;;  %v1510_v33 = vld [vmem:[#allocation13 + $0x30] sm:$0xff]  }
 0x1af   :  { %1324 = vmatmul.mubr.bf16.vlgmr.msra.gmra.mrb[0].mxu1 %v304_v34  ;;  %v1511_v34 = vld [vmem:[#allocation13 + $0x38] sm:$0xff]  }
 0x1b0   :  { %1363 = vmatprep.mubr.msk.bf16.mxu1 %vm1772_vm0, %v1771_v0  ;;  %1348 = vmatpush3.bf16.msra.mxu1 %v1488_v38  ;;  %v1515_v38 = vld [vmem:[#allocation14 + $0x18] sm:$0xff]  }
 0x1b1   :  { %1349 = vmatprep.subr.bf16.mxu1 %v1771_v0 }
 0x1b4   :  { %1350 = vmatpush3.bf16.msra.mxu1 %v1489_v39  ;;  %v1516_v39 = vld [vmem:[#allocation14 + $0x20] sm:$0xff]  }
 0x1b5   :  { %1351 = vmatprep.subr.bf16.mxu1 %v1771_v0 }
 0x1b8   :  { %1352 = vmatpush3.bf16.msra.mxu1 %v1490_v40  ;;  %v1179_v40 = vld [vmem:[%s2158_s13] ss:$0 sm:$0xff] }
 0x1b9   :  { %1353 = vmatprep.subr.bf16.mxu1 %v1771_v0 }
 0x1bc   :  { %1354 = vmatpush3.bf16.msra.mxu1 %v1491_v41 }
 0x1bd   :  { %1355 = vmatprep.subr.bf16.mxu1 %v1771_v0 }
 0x1c0   :  { %1356 = vmatpush3.bf16.msra.mxu1 %v1492_v42 }
 0x1c1   :  { %1357 = vmatprep.subr.bf16.mxu1 %v1771_v0 }
 0x1c4   :  { %1358 = vmatpush3.bf16.msra.mxu1 %v1493_v55  ;;  %v1520_v55 = vld [vmem:[#allocation16] sm:$0xff]  }
 0x1c5   :  { %1359 = vmatprep.subr.bf16.mxu1 %v1771_v0 }
 0x1c8   :  { %1360 = vmatpush3.bf16.msra.mxu1 %v1494_v56  ;;  %v1521_v56 = vld [vmem:[#allocation16 + $0x8] sm:$0xff]  }
 0x1c9   :  { %1361 = vmatprep.subr.bf16.mxu1 %v1771_v0 }
 0x1cc   :  { %1362 = vmatpush3.bf16.msra.mxu1 %v1495_v57  ;;  %v1522_v57 = vld [vmem:[#allocation16 + $0x10] sm:$0xff]  }
 0x1cd   :  { %1387 = vmatprep.subr.bf16.mxu1 %v1771_v0 }
 0x282   :  { %v410_v44 = vpop.f32.mrb[0].mxu1 }
 0x283   :  { %v411_v45 = vadd.f32 %v1152_v43, %v410_v44  ;;  %v1325_v46 = vpop.f32.mrb[1].mxu1 }
 0x284   :  { %v413_v47 = vpop.f32.mrb[2].mxu1 }
 0x285   :  { %v417_v48 = vmul.f32 0.2, %v411_v45  ;;  %v414_v49 = vadd.f32 %v1152_v43, %v413_v47  ;;  %v1326_v50 = vpop.f32.mrb[3].mxu1 }
 0x287   :  { %v418_v51 = vmul.f32 0.2, %v414_v49  ;;  %v419_v52 = vmax.f32 %v411_v45, %v417_v48 }
 0x289   :  { %v420_v53 = vmax.f32 %v414_v49, %v418_v51 }
 0x28b   :  { %v421_v54 = vpack.c.bf16 %v420_v53, %v419_v52  ;;  %v1517_v52 = vld [vmem:[#allocation14 + $0x28] sm:$0xff]   ;;  %v1518_v53 = vld [vmem:[#allocation14 + $0x30] sm:$0xff]  }
 0x28d   :  { %1344 = vmatmul.mubr.bf16.vlgmr.msra.gmra.mrb[4].mxu0 %v421_v54  ;;  %v1519_v54 = vld [vmem:[#allocation14 + $0x38] sm:$0xff]  }
 0x28e   :  { %1383 = vmatprep.mubr.msk.bf16.mxu0 %vm1772_vm0, %v1771_v0  ;;  %1368 = vmatpush3.bf16.msra.mxu0 %v1496_v58  ;;  %v1523_v58 = vld [vmem:[#allocation16 + $0x18] sm:$0xff]  }
 0x28f   :  { %1369 = vmatprep.subr.bf16.mxu0 %v1771_v0 }
 0x292   :  { %1370 = vmatpush3.bf16.msra.mxu0 %v1497_v59  ;;  %v1524_v59 = vld [vmem:[#allocation16 + $0x20] sm:$0xff]  }
 0x293   :  { %1371 = vmatprep.subr.bf16.mxu0 %v1771_v0 }
 0x296   :  { %1372 = vmatpush3.bf16.msra.mxu0 %v1498_v60  ;;  %v1188_v60 = vld [vmem:[%s2159_s14] ss:$0 sm:$0xff] }
 0x297   :  { %1373 = vmatprep.subr.bf16.mxu0 %v1771_v0 }
 0x29a   :  { %1374 = vmatpush3.bf16.msra.mxu0 %v1499_v61 }
 0x29b   :  { %1375 = vmatprep.subr.bf16.mxu0 %v1771_v0 }
 0x29e   :  { %1376 = vmatpush3.bf16.msra.mxu0 %v1500_v62 }
 0x29f   :  { %1377 = vmatprep.subr.bf16.mxu0 %v1771_v0 }
 0x2a2   :  { %1378 = vmatpush3.bf16.msra.mxu0 %v1501_v12  ;;  %v1197_v12 = vld [vmem:[%s2160_s15] ss:$0 sm:$0xff]  ;;  %s1726_s15 = scalar_lea.vmem %s1127_s5, 256 }
 0x2a3   :  { %1379 = vmatprep.subr.bf16.mxu0 %v1771_v0  ;;  %p1727_p2 = scmp.ne.s32.totalorder %s1127_s5, %s1726_s15  ;;  %p1732_p4 = scmp.lt.s32.totalorder %s1726_s15, %s1726_s15 }
 0x2a5   :  { %p1733_p5 = por %p1732_p4, %p1731_p3 }
 0x2a6   :  { %1380 = vmatpush3.bf16.msra.mxu0 %v1502_v13 }
 0x2a7   :  { %1381 = vmatprep.subr.bf16.mxu0 %v1771_v0  ;;  %p1734_p6 = pnand %p1733_p5, %p1727_p2 }
 0x2aa   :  { %1382 = vmatpush3.bf16.msra.mxu0 %v1503_v14 }
 0x2ab   :  { %1407 = vmatprep.subr.bf16.mxu0 %v1771_v0 }
 0x360   :  { %v527_v1 = vpop.f32.mrb[4].mxu0 }
 0x361   :  { %v528_v2 = vadd.f32 %v1161_v63, %v527_v1  ;;  %v1345_v3 = vpop.f32.mrb[5].mxu0 }
 0x362   :  { %v530_v4 = vpop.f32.mrb[6].mxu0 }
 0x363   :  { %v534_v5 = vmul.f32 0.2, %v528_v2  ;;  %v531_v6 = vadd.f32 %v1161_v63, %v530_v4  ;;  %v1346_v7 = vpop.f32.mrb[7].mxu0 }
 0x365   :  { %v535_v8 = vmul.f32 0.2, %v531_v6  ;;  %v536_v9 = vmax.f32 %v528_v2, %v534_v5 }
 0x367   :  { %v537_v10 = vmax.f32 %v531_v6, %v535_v8 }
 0x369   :  { %v538_v11 = vpack.c.bf16 %v537_v10, %v536_v9  ;;  %v1525_v9 = vld [vmem:[#allocation16 + $0x28] sm:$0xff]   ;;  %v1526_v10 = vld [vmem:[#allocation16 + $0x30] sm:$0xff]  }
 0x36b   :  { %1364 = vmatmul.mubr.bf16.vlgmr.msra.gmra.mrb[4].mxu1 %v538_v11  ;;  %v1527_v11 = vld [vmem:[#allocation16 + $0x38] sm:$0xff]  }
 0x36c   :  { %1403 = vmatprep.mubr.msk.bf16.mxu1 %vm1772_vm0, %v1771_v0  ;;  %1388 = vmatpush3.bf16.msra.mxu1 %v1504_v15 }
 0x36d   :  { %1389 = vmatprep.subr.bf16.mxu1 %v1771_v0 }
 0x370   :  { %1390 = vmatpush3.bf16.msra.mxu1 %v1505_v16 }
 0x371   :  { %1391 = vmatprep.subr.bf16.mxu1 %v1771_v0 }
 0x374   :  { %1392 = vmatpush3.bf16.msra.mxu1 %v1506_v17 }
 0x375   :  { %1393 = vmatprep.subr.bf16.mxu1 %v1771_v0 }
 0x378   :  { %1394 = vmatpush3.bf16.msra.mxu1 %v1507_v18 }
 0x379   :  { %1395 = vmatprep.subr.bf16.mxu1 %v1771_v0 }
 0x37c   :  { %1396 = vmatpush3.bf16.msra.mxu1 %v1508_v19 }
 0x37d   :  { %1397 = vmatprep.subr.bf16.mxu1 %v1771_v0 }
 0x380   :  { %1398 = vmatpush3.bf16.msra.mxu1 %v1509_v32 }
 0x381   :  { %1399 = vmatprep.subr.bf16.mxu1 %v1771_v0 }
 0x384   :  { %1400 = vmatpush3.bf16.msra.mxu1 %v1510_v33 }
 0x385   :  { %1401 = vmatprep.subr.bf16.mxu1 %v1771_v0 }
 0x388   :  { %1402 = vmatpush3.bf16.msra.mxu1 %v1511_v34 }
 0x389   :  { %1427 = vmatprep.subr.bf16.mxu1 %v1771_v0 }
 0x43e   :  { %v644_v21 = vpop.f32.mrb[4].mxu1 }
 0x43f   :  { %v645_v22 = vadd.f32 %v1170_v20, %v644_v21  ;;  %v1365_v23 = vpop.f32.mrb[5].mxu1 }
 0x440   :  { %v647_v24 = vpop.f32.mrb[6].mxu1 }
 0x441   :  { %v651_v25 = vmul.f32 0.2, %v645_v22  ;;  %v648_v26 = vadd.f32 %v1170_v20, %v647_v24  ;;  %v1366_v27 = vpop.f32.mrb[7].mxu1 }
 0x443   :  { %v652_v28 = vmul.f32 0.2, %v648_v26  ;;  %v653_v29 = vmax.f32 %v645_v22, %v651_v25 }
 0x445   :  { %v654_v30 = vmax.f32 %v648_v26, %v652_v28 }
 0x447   :  { %v655_v31 = vpack.c.bf16 %v654_v30, %v653_v29 }
 0x449   :  { %1384 = vmatmul.mubr.bf16.vlgmr.msra.gmra.mrb[8].mxu0 %v655_v31 }
 0x44a   :  { %1423 = vmatprep.mubr.msk.bf16.mxu0 %vm1772_vm0, %v1771_v0  ;;  %1408 = vmatpush3.bf16.msra.mxu0 %v1512_v35 }
 0x44b   :  { %1409 = vmatprep.subr.bf16.mxu0 %v1771_v0 }
 0x44e   :  { %1410 = vmatpush3.bf16.msra.mxu0 %v1513_v36 }
 0x44f   :  { %1411 = vmatprep.subr.bf16.mxu0 %v1771_v0 }
 0x452   :  { %1412 = vmatpush3.bf16.msra.mxu0 %v1514_v37 }
 0x453   :  { %1413 = vmatprep.subr.bf16.mxu0 %v1771_v0 }
 0x456   :  { %1414 = vmatpush3.bf16.msra.mxu0 %v1515_v38 }
 0x457   :  { %1415 = vmatprep.subr.bf16.mxu0 %v1771_v0 }
 0x45a   :  { %1416 = vmatpush3.bf16.msra.mxu0 %v1516_v39 }
 0x45b   :  { %1417 = vmatprep.subr.bf16.mxu0 %v1771_v0 }
 0x45e   :  { %1418 = vmatpush3.bf16.msra.mxu0 %v1517_v52 }
 0x45f   :  { %1419 = vmatprep.subr.bf16.mxu0 %v1771_v0 }
 0x462   :  { %1420 = vmatpush3.bf16.msra.mxu0 %v1518_v53 }
 0x463   :  { %1421 = vmatprep.subr.bf16.mxu0 %v1771_v0 }
 0x466   :  { %1422 = vmatpush3.bf16.msra.mxu0 %v1519_v54 }
 0x51c   :  { %v761_v41 = vpop.f32.mrb[8].mxu0 }
 0x51d   :  { %v762_v42 = vadd.f32 %v1179_v40, %v761_v41  ;;  %v1385_v43 = vpop.f32.mrb[9].mxu0 }
 0x51e   :  { %v764_v44 = vpop.f32.mrb[10].mxu0 }
 0x51f   :  { %v768_v45 = vmul.f32 0.2, %v762_v42  ;;  %v765_v46 = vadd.f32 %v1179_v40, %v764_v44  ;;  %v1386_v47 = vpop.f32.mrb[11].mxu0 }
 0x521   :  { %v769_v48 = vmul.f32 0.2, %v765_v46  ;;  %v770_v49 = vmax.f32 %v762_v42, %v768_v45 }
 0x523   :  { %v771_v50 = vmax.f32 %v765_v46, %v769_v48 }
 0x525   :  { %v772_v51 = vpack.c.bf16 %v771_v50, %v770_v49 }
 0x527   :  { %1404 = vmatmul.mubr.bf16.vlgmr.msra.gmra.mrb[8].mxu1 %v772_v51 }
 0x528   :  { %1443 = vmatprep.mubr.msk.bf16.mxu1 %vm1772_vm0, %v1771_v0  ;;  %1428 = vmatpush3.bf16.msra.mxu1 %v1520_v55 }
 0x529   :  { %1429 = vmatprep.subr.bf16.mxu1 %v1771_v0 }
 0x52c   :  { %1430 = vmatpush3.bf16.msra.mxu1 %v1521_v56 }
 0x52d   :  { %1431 = vmatprep.subr.bf16.mxu1 %v1771_v0 }
 0x530   :  { %1432 = vmatpush3.bf16.msra.mxu1 %v1522_v57 }
 0x531   :  { %1433 = vmatprep.subr.bf16.mxu1 %v1771_v0 }
 0x534   :  { %1434 = vmatpush3.bf16.msra.mxu1 %v1523_v58 }
 0x535   :  { %1435 = vmatprep.subr.bf16.mxu1 %v1771_v0 }
 0x538   :  { %1436 = vmatpush3.bf16.msra.mxu1 %v1524_v59 }
 0x539   :  { %1437 = vmatprep.subr.bf16.mxu1 %v1771_v0 }
 0x53c   :  { %1438 = vmatpush3.bf16.msra.mxu1 %v1525_v9 }
 0x53d   :  { %1439 = vmatprep.subr.bf16.mxu1 %v1771_v0 }
 0x540   :  { %1440 = vmatpush3.bf16.msra.mxu1 %v1526_v10 }
 0x541   :  { %1441 = vmatprep.subr.bf16.mxu1 %v1771_v0  ;;  %v1206_v0 = vld [vmem:[%s2161_s16] ss:$0 sm:$0xff] }
 0x544   :  { %1442 = vmatpush3.bf16.msra.mxu1 %v1527_v11 }
 0x5fa   :  { %v878_v61 = vpop.f32.mrb[8].mxu1 }
 0x5fb   :  { %v879_v62 = vadd.f32 %v1188_v60, %v878_v61  ;;  %v1405_v63 = vpop.f32.mrb[9].mxu1 }
 0x5fc   :  { %v881_v1 = vpop.f32.mrb[10].mxu1 }
 0x5fd   :  { %v885_v2 = vmul.f32 0.2, %v879_v62  ;;  %v882_v3 = vadd.f32 %v1188_v60, %v881_v1  ;;  %v1406_v4 = vpop.f32.mrb[11].mxu1 }
 0x5ff   :  { %v886_v5 = vmul.f32 0.2, %v882_v3  ;;  %v887_v6 = vmax.f32 %v879_v62, %v885_v2 }
 0x601   :  { %v888_v7 = vmax.f32 %v882_v3, %v886_v5 }
 0x603   :  { %v889_v8 = vpack.c.bf16 %v888_v7, %v887_v6 }
 0x605   :  { %1424 = vmatmul.mubr.bf16.vlgmr.msra.gmra.mrb[12].mxu0 %v889_v8 }
 0x6d8   :  { %v995_v13 = vpop.f32.mrb[12].mxu0 }
 0x6d9   :  { %v996_v14 = vadd.f32 %v1197_v12, %v995_v13  ;;  %v1425_v15 = vpop.f32.mrb[13].mxu0 }
 0x6da   :  { %v998_v16 = vpop.f32.mrb[14].mxu0 }
 0x6db   :  { %v1002_v17 = vmul.f32 0.2, %v996_v14  ;;  %v999_v18 = vadd.f32 %v1197_v12, %v998_v16  ;;  %v1426_v19 = vpop.f32.mrb[15].mxu0 }
 0x6dd   :  { %v1003_v20 = vmul.f32 0.2, %v999_v18  ;;  %v1004_v21 = vmax.f32 %v996_v14, %v1002_v17 }
 0x6df   :  { %v1005_v22 = vmax.f32 %v999_v18, %v1003_v20 }
 0x6e1   :  { %v1006_v23 = vpack.c.bf16 %v1005_v22, %v1004_v21 }
 0x6e3   :  { %1444 = vmatmul.mubr.bf16.vlgmr.msra.gmra.mrb[12].mxu1 %v1006_v23 }
 0x7b6   :  { %v1112_v24 = vpop.f32.mrb[12].mxu1 }
 0x7b7   :  { %v1113_v25 = vadd.f32 %v1206_v0, %v1112_v24  ;;  %v1445_v26 = vpop.f32.mrb[13].mxu1 }
 0x7b8   :  { %v1115_v27 = vpop.f32.mrb[14].mxu1 }
 0x7b9   :  { %1119 = vst [vmem:[#allocation17] sm:$0xff] %v1113_v25  ;;  %v1116_v28 = vadd.f32 %v1206_v0, %v1115_v27  ;;  %v1446_v29 = vpop.f32.mrb[15].mxu1 }
 0x7bb   :  { %1120 = vst [vmem:[#allocation17 + $0x8] sm:$0xff] %v1116_v28 }
 0x7bc   :  { %1737 = shalt.err (!%p1734_p6)
}
 0x7bd   :  { %s2171_s20 = sld [smem:[#allocation26_spill]] }
 0x7c3   :  { %s1738_s3 = scalar_lea.hbm %s2171_s20, 256 }
 0x7c4   :  { %p1739_p7 = scmp.ne.s32.totalorder %s2171_s20, %s1738_s3  ;;  %p1742_p8 = scmp.lt.u32.totalorder %s1738_s3, %s2171_s20 }
 0x7c6   :  { %p1744_p9 = pnand %p1742_p8, %p1739_p7 }
 0x7c8   :  { %1747 = shalt.err (!%p1744_p9)
}
 0x7c9   :  { %s1774_s17 = smov 128   ;;  %s1775_s28 = smov 8  }
 0x7ca   :  { %1132 = dma.vmem_to_hbm [thread:$0]  %s1127_s5, 256, %s2171_s20, [#allocation4], %s1774_s17, %s1774_s17, %s1775_s28  }
 0x7cb   :  { %1758 = dma.done.wait [#allocation4], 256  }
 0x7cc   :  { %1759 = vsyncadd [#allocation4], 4294967040 }
 0x7cd   :  { %1136 = vsyncpa [#allocation3], 1 }
 0x7ce   :  { %1137 = vsyncpa [#allocation6], 1 }
 0x7cf   :  { %1138 = vsyncpa [#allocation9], 1 }
 0x7d0   :  { %1139 = vsyncpa [#allocation12], 1 }
 0x7d1   :  { %1140 = vsyncpa [#allocation15], 1 }
 0x7d2   :  { %1141 = vsyncpa [#allocation4], 1 }

// kernel: tpu_custom_call.1
= control target key start
LH: loop header
LB: loop body
LE: loop exit
PB: predicated region body
PF: predicated region fallthrough
CT: control target
= control target key end

     0   :  { %s2145_s0 = inlined_call_operand.hbm [shape: bf16[16,128], index: 0, kind: input, shape index: {}]   ;;  %s2146_s1 = inlined_call_operand.hbm [shape: bf16[128,128], index: 1, kind: input, shape index: {}]   ;;  %s2147_s2 = inlined_call_operand.hbm [shape: bf16[128,128], index: 2, kind: input, shape index: {}]   ;;  %s2148_s3 = inlined_call_operand.hbm [shape: bf16[128,128], index: 3, kind: input, shape index: {}]   ;;  %s2149_s4 = inlined_call_operand.hbm [shape: bf16[128,128], index: 4, kind: input, shape index: {}]   ;;  %s2150_s5 = inlined_call_operand.hbm [shape: bf16[128,128], index: 5, kind: input, shape index: {}]   ;;  %s2151_s6 = inlined_call_operand.hbm [shape: bf16[128,128], index: 6, kind: input, shape index: {}]   ;;  %s2152_s7 = inlined_call_operand.hbm [shape: bf16[128,128], index: 7, kind: input, shape index: {}]   ;;  %s2153_s8 = inlined_call_operand.hbm [shape: bf16[128,128], index: 8, kind: input, shape index: {}]   ;;  %s2154_s9 = inlined_call_operand.vmem [shape: f32[1,128], index: 9, kind: input, shape index: {}]   ;;  %s2155_s10 = inlined_call_operand.vmem [shape: f32[1,128], index: 10, kind: input, shape index: {}]   ;;  %s2156_s11 = inlined_call_operand.vmem [shape: f32[1,128], index: 11, kind: input, shape index: {}]   ;;  %s2157_s12 = inlined_call_operand.vmem [shape: f32[1,128], index: 12, kind: input, shape index: {}]   ;;  %s2158_s13 = inlined_call_operand.vmem [shape: f32[1,128], index: 13, kind: input, shape index: {}]   ;;  %s2159_s14 = inlined_call_operand.vmem [shape: f32[1,128], index: 14, kind: input, shape index: {}]   ;;  %s2160_s15 = inlined_call_operand.vmem [shape: f32[1,128], index: 15, kind: input, shape index: {}]   ;;  %s2161_s16 = inlined_call_operand.vmem [shape: f32[1,128], index: 16, kind: input, shape index: {}]   ;;  %s2162_s17 = inlined_call_operand.hbm [shape: f32[16,128], index: 17, kind: output, shape index: {}]  }
   0x1   :  { %2166 = sst [smem:[#allocation24_spill]] %s2145_s0 }
   0x2   :  { %2167 = sst [smem:[#allocation25_spill]] %s2146_s1 }
   0x3   :  { %2168 = sst [smem:[#allocation26_spill]] %s2162_s17 }
   0x4   :  { %22 = vsyncpa [#allocation3], 0 }
   0x5   :  { %23 = vsyncpa [#allocation6], 0 }
   0x6   :  { %24 = vsyncpa [#allocation9], 0 }
   0x7   :  { %25 = vsyncpa [#allocation12], 0 }
   0x8   :  { %26 = vsyncpa [#allocation15], 0 }
   0x9   :  { %27 = vsyncpa [#allocation4], 0  ;;  %s1760_s24 = smov [#allocation5]   ;;  %s1761_s26 = smov [#allocation8]  }
   0xa   :  { %s45_s25 = sshll.u32 %s1760_s24, 4  ;;  %s69_s27 = sshll.u32 %s1761_s26, 4  ;;  %s46_s25 = int_to_ptr.vmem [resolvable:$true] %s45_s25  ;;  %s1866_s27 = int_to_ptr.vmem [resolvable:$true] %s69_s27 }
   0xb   :  { %s2169_s0 = sld [smem:[#allocation25_spill]] }
  0x11   :  { %s1528_s30 = scalar_lea.hbm %s2169_s0, 1024 }
  0x12   :  { %p1529_p0 = scmp.ne.s32.totalorder %s2169_s0, %s1528_s30  ;;  %p1532_p1 = scmp.lt.u32.totalorder %s1528_s30, %s2169_s0 }
  0x14   :  { %p1534_p2 = pnand %p1532_p1, %p1529_p0 }
  0x16   :  { %1537 = shalt.err (!%p1534_p2)
}
  0x17   :  { %s1538_s21 = scalar_lea.vmem %s46_s25, 1024  ;;  %p1543_p4 = scmp.lt.s32.totalorder %s46_s25, %s46_s25 }
  0x18   :  { %p1539_p3 = scmp.ne.s32.totalorder %s46_s25, %s1538_s21  ;;  %p1544_p5 = scmp.lt.s32.totalorder %s1538_s21, %s1538_s21 }
  0x1a   :  { %p1545_p6 = por %p1544_p5, %p1543_p4 }
  0x1c   :  { %p1546_p7 = pnand %p1545_p6, %p1539_p3 }
  0x1e   :  { %1549 = shalt.err (!%p1546_p7)
}
  0x1f   :  { %s1762_s22 = smov 64   ;;  %s1763_s23 = smov 4  }
  0x20   :  { %51 = dma.hbm_to_vmem [thread:$0]  %s2169_s0, 1024, %s46_s25, [#allocation6], %s1762_s22, %s1762_s22, %s1763_s23  }
  0x21   :  { %s1550_s30 = scalar_lea.hbm %s2148_s3, 1024 }
  0x22   :  { %p1551_p8 = scmp.ne.s32.totalorder %s2148_s3, %s1550_s30  ;;  %p1554_p9 = scmp.lt.u32.totalorder %s1550_s30, %s2148_s3 }
  0x24   :  { %p1556_p10 = pnand %p1554_p9, %p1551_p8 }
  0x26   :  { %1559 = shalt.err (!%p1556_p10)
}
  0x27   :  { %s1560_s21 = scalar_lea.vmem %s1866_s27, 1024  ;;  %p1565_p12 = scmp.lt.s32.totalorder %s1866_s27, %s1866_s27 }
  0x28   :  { %p1561_p11 = scmp.ne.s32.totalorder %s1866_s27, %s1560_s21  ;;  %p1566_p13 = scmp.lt.s32.totalorder %s1560_s21, %s1560_s21 }
  0x2a   :  { %p1567_p0 = por %p1566_p13, %p1565_p12 }
  0x2c   :  { %p1568_p1 = pnand %p1567_p0, %p1561_p11 }
  0x2e   :  { %1571 = shalt.err (!%p1568_p1)
}
  0x2f   :  { %75 = dma.hbm_to_vmem [thread:$0]  %s2148_s3, 1024, %s1866_s27, [#allocation9], %s1762_s22, %s1762_s22, %s1763_s23  }
  0x30   :  { %s1764_s24 = smov [#allocation11]   ;;  %s1765_s28 = smov [#allocation14]  }
  0x31   :  { %s93_s26 = sshll.u32 %s1764_s24, 4  ;;  %s117_s29 = sshll.u32 %s1765_s28, 4  ;;  %s94_s26 = int_to_ptr.vmem [resolvable:$true] %s93_s26  ;;  %s1903_s29 = int_to_ptr.vmem [resolvable:$true] %s117_s29 }
  0x32   :  { %s1572_s19 = scalar_lea.hbm %s2150_s5, 1024 }
  0x33   :  { %p1573_p2 = scmp.ne.s32.totalorder %s2150_s5, %s1572_s19  ;;  %p1576_p3 = scmp.lt.u32.totalorder %s1572_s19, %s2150_s5 }
  0x35   :  { %p1578_p4 = pnand %p1576_p3, %p1573_p2 }
  0x37   :  { %1581 = shalt.err (!%p1578_p4)
}
  0x38   :  { %s1582_s3 = scalar_lea.vmem %s94_s26, 1024  ;;  %p1587_p6 = scmp.lt.s32.totalorder %s94_s26, %s94_s26 }
  0x39   :  { %p1583_p5 = scmp.ne.s32.totalorder %s94_s26, %s1582_s3  ;;  %p1588_p7 = scmp.lt.s32.totalorder %s1582_s3, %s1582_s3 }
  0x3b   :  { %p1589_p8 = por %p1588_p7, %p1587_p6 }
  0x3d   :  { %p1590_p9 = pnand %p1589_p8, %p1583_p5 }
  0x3f   :  { %1593 = shalt.err (!%p1590_p9)
}
  0x40   :  { %99 = dma.hbm_to_vmem [thread:$0]  %s2150_s5, 1024, %s94_s26, [#allocation12], %s1762_s22, %s1762_s22, %s1763_s23  }
  0x41   :  { %s1594_s17 = scalar_lea.hbm %s2152_s7, 1024 }
  0x42   :  { %p1595_p10 = scmp.ne.s32.totalorder %s2152_s7, %s1594_s17  ;;  %p1598_p11 = scmp.lt.u32.totalorder %s1594_s17, %s2152_s7 }
  0x44   :  { %p1600_p12 = pnand %p1598_p11, %p1595_p10 }
  0x46   :  { %1603 = shalt.err (!%p1600_p12)
}
  0x47   :  { %s1604_s1 = scalar_lea.vmem %s1903_s29, 1024  ;;  %p1609_p0 = scmp.lt.s32.totalorder %s1903_s29, %s1903_s29 }
  0x48   :  { %p1605_p13 = scmp.ne.s32.totalorder %s1903_s29, %s1604_s1  ;;  %p1610_p1 = scmp.lt.s32.totalorder %s1604_s1, %s1604_s1 }
  0x4a   :  { %p1611_p2 = por %p1610_p1, %p1609_p0 }
  0x4c   :  { %p1612_p3 = pnand %p1611_p2, %p1605_p13 }
  0x4e   :  { %1615 = shalt.err (!%p1612_p3)
}
  0x4f   :  { %123 = dma.hbm_to_vmem [thread:$0]  %s2152_s7, 1024, %s1903_s29, [#allocation15], %s1762_s22, %s1762_s22, %s1763_s23  }
  0x50   :  { %s1766_s20 = smov [#allocation2]   ;;  %s1767_s3 = smov [#allocation7]  }
  0x51   :  { %s33_s21 = sshll.u32 %s1766_s20, 4  ;;  %s57_s27 = sshll.u32 %s1767_s3, 4  ;;  %s34_s21 = int_to_ptr.vmem [resolvable:$true] %s33_s21  ;;  %s1940_s27 = int_to_ptr.vmem [resolvable:$true] %s57_s27 }
  0x52   :  { %s2170_s24 = sld [smem:[#allocation24_spill]] }
  0x58   :  { %s1616_s17 = scalar_lea.hbm %s2170_s24, 128 }
  0x59   :  { %p1617_p4 = scmp.ne.s32.totalorder %s2170_s24, %s1616_s17  ;;  %p1620_p5 = scmp.lt.u32.totalorder %s1616_s17, %s2170_s24 }
  0x5b   :  { %p1622_p6 = pnand %p1620_p5, %p1617_p4 }
  0x5d   :  { %1625 = shalt.err (!%p1622_p6)
}
  0x5e   :  { %s1626_s7 = scalar_lea.vmem %s34_s21, 128  ;;  %p1631_p8 = scmp.lt.s32.totalorder %s34_s21, %s34_s21 }
  0x5f   :  { %p1627_p7 = scmp.ne.s32.totalorder %s34_s21, %s1626_s7  ;;  %p1632_p9 = scmp.lt.s32.totalorder %s1626_s7, %s1626_s7 }
  0x61   :  { %p1633_p10 = por %p1632_p9, %p1631_p8 }
  0x63   :  { %p1634_p11 = pnand %p1633_p10, %p1627_p7 }
  0x65   :  { %1637 = shalt.err (!%p1634_p11)
}
  0x66   :  { %39 = dma.hbm_to_vmem [thread:$0]  %s2170_s24, 128, %s34_s21, [#allocation3], %s1762_s22, %s1762_s22, %s1763_s23  }
  0x67   :  { %s1638_s20 = scalar_lea.hbm %s2147_s2, 1024 }
  0x68   :  { %p1639_p12 = scmp.ne.s32.totalorder %s2147_s2, %s1638_s20  ;;  %p1642_p13 = scmp.lt.u32.totalorder %s1638_s20, %s2147_s2 }
  0x6a   :  { %p1644_p0 = pnand %p1642_p13, %p1639_p12 }
  0x6c   :  { %1647 = shalt.err (!%p1644_p0)
}
  0x6d   :  { %s1648_s28 = scalar_lea.vmem %s1940_s27, 1024  ;;  %p1653_p2 = scmp.lt.s32.totalorder %s1940_s27, %s1940_s27 }
  0x6e   :  { %p1649_p1 = scmp.ne.s32.totalorder %s1940_s27, %s1648_s28  ;;  %p1654_p3 = scmp.lt.s32.totalorder %s1648_s28, %s1648_s28 }
  0x70   :  { %p1655_p4 = por %p1654_p3, %p1653_p2 }
  0x72   :  { %p1656_p5 = pnand %p1655_p4, %p1649_p1 }
  0x74   :  { %1659 = shalt.err (!%p1656_p5)
}
  0x75   :  { %63 = dma.hbm_to_vmem [thread:$0]  %s2147_s2, 1024, %s1940_s27, [#allocation6], %s1762_s22, %s1762_s22, %s1763_s23  }
  0x76   :  { %s1768_s30 = smov [#allocation10]   ;;  %s1769_s19 = smov [#allocation13]  }
  0x77   :  { %s81_s18 = sshll.u32 %s1768_s30, 4  ;;  %s105_s7 = sshll.u32 %s1769_s19, 4  ;;  %s82_s18 = int_to_ptr.vmem [resolvable:$true] %s81_s18  ;;  %s1977_s7 = int_to_ptr.vmem [resolvable:$true] %s105_s7 }
  0x78   :  { %s1660_s5 = scalar_lea.hbm %s2149_s4, 1024 }
  0x79   :  { %p1661_p6 = scmp.ne.s32.totalorder %s2149_s4, %s1660_s5  ;;  %p1664_p7 = scmp.lt.u32.totalorder %s1660_s5, %s2149_s4 }
  0x7b   :  { %p1666_p8 = pnand %p1664_p7, %p1661_p6 }
  0x7d   :  { %1669 = shalt.err (!%p1666_p8)
}
  0x7e   :  { %s1670_s2 = scalar_lea.vmem %s82_s18, 1024  ;;  %p1675_p10 = scmp.lt.s32.totalorder %s82_s18, %s82_s18 }
  0x7f   :  { %p1671_p9 = scmp.ne.s32.totalorder %s82_s18, %s1670_s2  ;;  %p1676_p11 = scmp.lt.s32.totalorder %s1670_s2, %s1670_s2 }
  0x81   :  { %p1677_p12 = por %p1676_p11, %p1675_p10 }
  0x83   :  { %p1678_p13 = pnand %p1677_p12, %p1671_p9 }
  0x85   :  { %1681 = shalt.err (!%p1678_p13)
}
  0x86   :  { %87 = dma.hbm_to_vmem [thread:$0]  %s2149_s4, 1024, %s82_s18, [#allocation9], %s1762_s22, %s1762_s22, %s1763_s23  }
  0x87   :  { %s1682_s21 = scalar_lea.hbm %s2151_s6, 1024 }
  0x88   :  { %p1683_p0 = scmp.ne.s32.totalorder %s2151_s6, %s1682_s21  ;;  %p1686_p1 = scmp.lt.u32.totalorder %s1682_s21, %s2151_s6 }
  0x8a   :  { %p1688_p2 = pnand %p1686_p1, %p1683_p0 }
  0x8c   :  { %1691 = shalt.err (!%p1688_p2)
}
  0x8d   :  { %s1692_s1 = scalar_lea.vmem %s1977_s7, 1024  ;;  %p1697_p4 = scmp.lt.s32.totalorder %s1977_s7, %s1977_s7 }
  0x8e   :  { %p1693_p3 = scmp.ne.s32.totalorder %s1977_s7, %s1692_s1  ;;  %p1698_p5 = scmp.lt.s32.totalorder %s1692_s1, %s1692_s1 }
  0x90   :  { %p1699_p6 = por %p1698_p5, %p1697_p4 }
  0x92   :  { %p1700_p7 = pnand %p1699_p6, %p1693_p3 }
  0x94   :  { %1703 = shalt.err (!%p1700_p7)
}
  0x95   :  { %111 = dma.hbm_to_vmem [thread:$0]  %s2151_s6, 1024, %s1977_s7, [#allocation12], %s1762_s22, %s1762_s22, %s1763_s23  }
  0x96   :  { %s1770_s5 = smov [#allocation16]   ;;  %s1704_s25 = scalar_lea.hbm %s2153_s8, 1024 }
  0x97   :  { %s129_s26 = sshll.u32 %s1770_s5, 4  ;;  %p1705_p8 = scmp.ne.s32.totalorder %s2153_s8, %s1704_s25  ;;  %s130_s26 = int_to_ptr.vmem [resolvable:$true] %s129_s26 }
  0x98   :  { %p1708_p9 = scmp.lt.u32.totalorder %s1704_s25, %s2153_s8 }
  0x9a   :  { %p1710_p10 = pnand %p1708_p9, %p1705_p8 }
  0x9c   :  { %1713 = shalt.err (!%p1710_p10)
}
  0x9d   :  { %s1714_s28 = scalar_lea.vmem %s130_s26, 1024  ;;  %p1719_p12 = scmp.lt.s32.totalorder %s130_s26, %s130_s26 }
  0x9e   :  { %p1715_p11 = scmp.ne.s32.totalorder %s130_s26, %s1714_s28  ;;  %p1720_p13 = scmp.lt.s32.totalorder %s1714_s28, %s1714_s28 }
  0xa0   :  { %p1721_p0 = por %p1720_p13, %p1719_p12 }
  0xa2   :  { %p1722_p1 = pnand %p1721_p0, %p1715_p11 }
  0xa4   :  { %1725 = shalt.err (!%p1722_p1)
}
  0xa5   :  { %135 = dma.hbm_to_vmem [thread:$0]  %s2153_s8, 1024, %s130_s26, [#allocation15], %s1762_s22, %s1762_s22, %s1763_s23  }
  0xa6   :  { %1748 = dma.done.wait [#allocation3], 128  }
  0xa7   :  { %1749 = vsyncadd [#allocation3], 4294967168 }
  0xa8   :  { %1750 = dma.done.wait [#allocation6], 2048  }
  0xa9   :  { %1751 = vsyncadd [#allocation6], 4294965248 }
  0xaa   :  { %1752 = dma.done.wait [#allocation9], 2048  }
  0xab   :  { %1753 = vsyncadd [#allocation9], 4294965248 }
  0xac   :  { %1754 = dma.done.wait [#allocation12], 2048  }
  0xad   :  { %1755 = vsyncadd [#allocation12], 4294965248 }
  0xae   :  { %1756 = dma.done.wait [#allocation15], 2048  }
  0xaf   :  { %1757 = vsyncadd [#allocation15], 4294965248  ;;  %v1771_v0 = vmov 0.0   ;;  %vm1772_vm0 = vmmov 0   ;;  %v1463_v1 = vld [vmem:[#allocation5] sm:$0xff]   ;;  %v1464_v2 = vld [vmem:[#allocation5 + $0x8] sm:$0xff]  }
  0xb0   :  { %1287 = vmatprep.subr.bf16.mxu0 %v1771_v0  ;;  %1303 = vmatprep.mubr.msk.bf16.mxu0 %vm1772_vm0, %v1771_v0  ;;  %v1465_v3 = vld [vmem:[#allocation5 + $0x10] sm:$0xff]   ;;  %v1472_v4 = vld [vmem:[#allocation7] sm:$0xff]   ;;  %v1466_v5 = vld [vmem:[#allocation5 + $0x18] sm:$0xff]   ;;  %s1773_s18 = smov [#allocation17]  }
  0xb1   :  { %1307 = vmatprep.subr.bf16.mxu1 %v1771_v0  ;;  %1323 = vmatprep.mubr.msk.bf16.mxu1 %vm1772_vm0, %v1771_v0  ;;  %v1473_v6 = vld [vmem:[#allocation7 + $0x8] sm:$0xff]   ;;  %v1467_v7 = vld [vmem:[#allocation5 + $0x20] sm:$0xff]   ;;  %v1474_v8 = vld [vmem:[#allocation7 + $0x10] sm:$0xff]   ;;  %s1126_s5 = sshll.u32 %s1773_s18, 4  ;;  %s1127_s5 = int_to_ptr.vmem [resolvable:$true] %s1126_s5 }
  0xb2   :  { %1288 = vmatpush3.bf16.msra.mxu0 %v1463_v1  ;;  %1308 = vmatpush3.bf16.msra.mxu1 %v1472_v4  ;;  %v1468_v9 = vld [vmem:[#allocation5 + $0x28] sm:$0xff]   ;;  %v1475_v10 = vld [vmem:[#allocation7 + $0x18] sm:$0xff]   ;;  %v1469_v11 = vld [vmem:[#allocation5 + $0x30] sm:$0xff]   ;;  %p1731_p3 = scmp.lt.s32.totalorder %s1127_s5, %s1127_s5 }
  0xb3   :  { %1289 = vmatprep.subr.bf16.mxu0 %v1771_v0  ;;  %1309 = vmatprep.subr.bf16.mxu1 %v1771_v0  ;;  %v1476_v12 = vld [vmem:[#allocation7 + $0x20] sm:$0xff]   ;;  %v1470_v13 = vld [vmem:[#allocation5 + $0x38] sm:$0xff]   ;;  %v1477_v15 = vld [vmem:[#allocation7 + $0x28] sm:$0xff]  }
  0xb4   :  { %v1471_v14 = vld [vmem:[#allocation2] sm:$0xff]   ;;  %v1478_v16 = vld [vmem:[#allocation7 + $0x30] sm:$0xff]   ;;  %v1480_v18 = vld [vmem:[#allocation8] sm:$0xff]  }
  0xb5   :  { %v1479_v17 = vld [vmem:[#allocation7 + $0x38] sm:$0xff]   ;;  %v1481_v19 = vld [vmem:[#allocation8 + $0x8] sm:$0xff]   ;;  %v1482_v20 = vld [vmem:[#allocation8 + $0x10] sm:$0xff]  }
  0xb6   :  { %1290 = vmatpush3.bf16.msra.mxu0 %v1464_v2  ;;  %1310 = vmatpush3.bf16.msra.mxu1 %v1473_v6  ;;  %v1483_v21 = vld [vmem:[#allocation8 + $0x18] sm:$0xff]   ;;  %v1484_v22 = vld [vmem:[#allocation8 + $0x20] sm:$0xff]   ;;  %v1485_v35 = vld [vmem:[#allocation8 + $0x28] sm:$0xff]  }
  0xb7   :  { %1291 = vmatprep.subr.bf16.mxu0 %v1771_v0  ;;  %1311 = vmatprep.subr.bf16.mxu1 %v1771_v0  ;;  %v1142_v23 = vld [vmem:[%s2154_s9] ss:$0 sm:$0xff]  ;;  %v1486_v36 = vld [vmem:[#allocation8 + $0x30] sm:$0xff]   ;;  %v1488_v38 = vld [vmem:[#allocation10] sm:$0xff]  }
  0xb8   :  { %v1487_v37 = vld [vmem:[#allocation8 + $0x38] sm:$0xff]   ;;  %v1489_v39 = vld [vmem:[#allocation10 + $0x8] sm:$0xff]   ;;  %v1490_v40 = vld [vmem:[#allocation10 + $0x10] sm:$0xff]  }
  0xb9   :  { %v1491_v41 = vld [vmem:[#allocation10 + $0x18] sm:$0xff]   ;;  %v1492_v42 = vld [vmem:[#allocation10 + $0x20] sm:$0xff]   ;;  %v1493_v55 = vld [vmem:[#allocation10 + $0x28] sm:$0xff]  }
  0xba   :  { %1292 = vmatpush3.bf16.msra.mxu0 %v1465_v3  ;;  %1312 = vmatpush3.bf16.msra.mxu1 %v1474_v8  ;;  %v1152_v43 = vld [vmem:[%s2155_s10] ss:$0 sm:$0xff]  ;;  %v1494_v56 = vld [vmem:[#allocation10 + $0x30] sm:$0xff]   ;;  %v1496_v58 = vld [vmem:[#allocation11] sm:$0xff]  }
  0xbb   :  { %1293 = vmatprep.subr.bf16.mxu0 %v1771_v0  ;;  %1313 = vmatprep.subr.bf16.mxu1 %v1771_v0  ;;  %v1495_v57 = vld [vmem:[#allocation10 + $0x38] sm:$0xff]   ;;  %v1497_v59 = vld [vmem:[#allocation11 + $0x8] sm:$0xff]   ;;  %v1498_v60 = vld [vmem:[#allocation11 + $0x10] sm:$0xff]  }
  0xbc   :  { %v1499_v61 = vld [vmem:[#allocation11 + $0x18] sm:$0xff]   ;;  %v1500_v62 = vld [vmem:[#allocation11 + $0x20] sm:$0xff]  }
  0xbd   :  { %v1161_v63 = vld [vmem:[%s2156_s11] ss:$0 sm:$0xff] }
  0xbe   :  { %1294 = vmatpush3.bf16.msra.mxu0 %v1466_v5  ;;  %1314 = vmatpush3.bf16.msra.mxu1 %v1475_v10 }
  0xbf   :  { %1295 = vmatprep.subr.bf16.mxu0 %v1771_v0  ;;  %1315 = vmatprep.subr.bf16.mxu1 %v1771_v0 }
  0xc2   :  { %1296 = vmatpush3.bf16.msra.mxu0 %v1467_v7  ;;  %1316 = vmatpush3.bf16.msra.mxu1 %v1476_v12  ;;  %v1501_v12 = vld [vmem:[#allocation11 + $0x28] sm:$0xff]  }
  0xc3   :  { %1297 = vmatprep.subr.bf16.mxu0 %v1771_v0  ;;  %1317 = vmatprep.subr.bf16.mxu1 %v1771_v0 }
  0xc6   :  { %1298 = vmatpush3.bf16.msra.mxu0 %v1468_v9  ;;  %1318 = vmatpush3.bf16.msra.mxu1 %v1477_v15  ;;  %v1504_v15 = vld [vmem:[#allocation13] sm:$0xff]  }
  0xc7   :  { %1299 = vmatprep.subr.bf16.mxu0 %v1771_v0  ;;  %1319 = vmatprep.subr.bf16.mxu1 %v1771_v0 }
  0xca   :  { %1300 = vmatpush3.bf16.msra.mxu0 %v1469_v11  ;;  %1320 = vmatpush3.bf16.msra.mxu1 %v1478_v16  ;;  %v1505_v16 = vld [vmem:[#allocation13 + $0x8] sm:$0xff]  }
  0xcb   :  { %1301 = vmatprep.subr.bf16.mxu0 %v1771_v0  ;;  %1321 = vmatprep.subr.bf16.mxu1 %v1771_v0 }
  0xce   :  { %1302 = vmatpush3.bf16.msra.mxu0 %v1470_v13  ;;  %1322 = vmatpush3.bf16.msra.mxu1 %v1479_v17  ;;  %v1502_v13 = vld [vmem:[#allocation11 + $0x30] sm:$0xff]  }
  0xcf   :  { %1327 = vmatprep.subr.bf16.mxu0 %v1771_v0  ;;  %1347 = vmatprep.subr.bf16.mxu1 %v1771_v0  ;;  %v1506_v17 = vld [vmem:[#allocation13 + $0x10] sm:$0xff]  }
  0xd1   :  { %1304 = vmatmul.mubr.bf16.vlgmr.msra.gmra.mrb[0].mxu0 %v1471_v14  ;;  %v1503_v14 = vld [vmem:[#allocation11 + $0x38] sm:$0xff]  }
  0xd2   :  { %1343 = vmatprep.mubr.msk.bf16.mxu0 %vm1772_vm0, %v1771_v0  ;;  %1328 = vmatpush3.bf16.msra.mxu0 %v1480_v18  ;;  %v1507_v18 = vld [vmem:[#allocation13 + $0x18] sm:$0xff]  }
  0xd3   :  { %1329 = vmatprep.subr.bf16.mxu0 %v1771_v0 }
  0xd6   :  { %1330 = vmatpush3.bf16.msra.mxu0 %v1481_v19  ;;  %v1508_v19 = vld [vmem:[#allocation13 + $0x20] sm:$0xff]  }
  0xd7   :  { %1331 = vmatprep.subr.bf16.mxu0 %v1771_v0 }
  0xda   :  { %1332 = vmatpush3.bf16.msra.mxu0 %v1482_v20  ;;  %v1170_v20 = vld [vmem:[%s2157_s12] ss:$0 sm:$0xff] }
  0xdb   :  { %1333 = vmatprep.subr.bf16.mxu0 %v1771_v0 }
  0xde   :  { %1334 = vmatpush3.bf16.msra.mxu0 %v1483_v21 }
  0xdf   :  { %1335 = vmatprep.subr.bf16.mxu0 %v1771_v0 }
  0xe2   :  { %1336 = vmatpush3.bf16.msra.mxu0 %v1484_v22 }
  0xe3   :  { %1337 = vmatprep.subr.bf16.mxu0 %v1771_v0 }
  0xe6   :  { %1338 = vmatpush3.bf16.msra.mxu0 %v1485_v35  ;;  %v1512_v35 = vld [vmem:[#allocation14] sm:$0xff]  }
  0xe7   :  { %1339 = vmatprep.subr.bf16.mxu0 %v1771_v0 }
  0xea   :  { %1340 = vmatpush3.bf16.msra.mxu0 %v1486_v36  ;;  %v1513_v36 = vld [vmem:[#allocation14 + $0x8] sm:$0xff]  }
  0xeb   :  { %1341 = vmatprep.subr.bf16.mxu0 %v1771_v0 }
  0xee   :  { %1342 = vmatpush3.bf16.msra.mxu0 %v1487_v37  ;;  %v1514_v37 = vld [vmem:[#allocation14 + $0x10] sm:$0xff]  }
  0xef   :  { %1367 = vmatprep.subr.bf16.mxu0 %v1771_v0 }
 0x1a4   :  { %v293_v24 = vpop.f32.mrb[0].mxu0 }
 0x1a5   :  { %v294_v25 = vadd.f32 %v1142_v23, %v293_v24  ;;  %v1305_v26 = vpop.f32.mrb[1].mxu0 }
 0x1a6   :  { %v296_v27 = vpop.f32.mrb[2].mxu0 }
 0x1a7   :  { %v300_v28 = vmul.f32 0.01, %v294_v25  ;;  %v297_v29 = vadd.f32 %v1142_v23, %v296_v27  ;;  %v1306_v30 = vpop.f32.mrb[3].mxu0 }
 0x1a9   :  { %v301_v31 = vmul.f32 0.01, %v297_v29  ;;  %v302_v32 = vmax.f32 %v294_v25, %v300_v28 }
 0x1ab   :  { %v303_v33 = vmax.f32 %v297_v29, %v301_v31 }
 0x1ad   :  { %v304_v34 = vpack.c.bf16 %v303_v33, %v302_v32  ;;  %v1509_v32 = vld [vmem:[#allocation13 + $0x28] sm:$0xff]   ;;  %v1510_v33 = vld [vmem:[#allocation13 + $0x30] sm:$0xff]  }
 0x1af   :  { %1324 = vmatmul.mubr.bf16.vlgmr.msra.gmra.mrb[0].mxu1 %v304_v34  ;;  %v1511_v34 = vld [vmem:[#allocation13 + $0x38] sm:$0xff]  }
 0x1b0   :  { %1363 = vmatprep.mubr.msk.bf16.mxu1 %vm1772_vm0, %v1771_v0  ;;  %1348 = vmatpush3.bf16.msra.mxu1 %v1488_v38  ;;  %v1515_v38 = vld [vmem:[#allocation14 + $0x18] sm:$0xff]  }
 0x1b1   :  { %1349 = vmatprep.subr.bf16.mxu1 %v1771_v0 }
 0x1b4   :  { %1350 = vmatpush3.bf16.msra.mxu1 %v1489_v39  ;;  %v1516_v39 = vld [vmem:[#allocation14 + $0x20] sm:$0xff]  }
 0x1b5   :  { %1351 = vmatprep.subr.bf16.mxu1 %v1771_v0 }
 0x1b8   :  { %1352 = vmatpush3.bf16.msra.mxu1 %v1490_v40  ;;  %v1179_v40 = vld [vmem:[%s2158_s13] ss:$0 sm:$0xff] }
 0x1b9   :  { %1353 = vmatprep.subr.bf16.mxu1 %v1771_v0 }
 0x1bc   :  { %1354 = vmatpush3.bf16.msra.mxu1 %v1491_v41 }
 0x1bd   :  { %1355 = vmatprep.subr.bf16.mxu1 %v1771_v0 }
 0x1c0   :  { %1356 = vmatpush3.bf16.msra.mxu1 %v1492_v42 }
 0x1c1   :  { %1357 = vmatprep.subr.bf16.mxu1 %v1771_v0 }
 0x1c4   :  { %1358 = vmatpush3.bf16.msra.mxu1 %v1493_v55  ;;  %v1520_v55 = vld [vmem:[#allocation16] sm:$0xff]  }
 0x1c5   :  { %1359 = vmatprep.subr.bf16.mxu1 %v1771_v0 }
 0x1c8   :  { %1360 = vmatpush3.bf16.msra.mxu1 %v1494_v56  ;;  %v1521_v56 = vld [vmem:[#allocation16 + $0x8] sm:$0xff]  }
 0x1c9   :  { %1361 = vmatprep.subr.bf16.mxu1 %v1771_v0 }
 0x1cc   :  { %1362 = vmatpush3.bf16.msra.mxu1 %v1495_v57  ;;  %v1522_v57 = vld [vmem:[#allocation16 + $0x10] sm:$0xff]  }
 0x1cd   :  { %1387 = vmatprep.subr.bf16.mxu1 %v1771_v0 }
 0x282   :  { %v410_v44 = vpop.f32.mrb[0].mxu1 }
 0x283   :  { %v411_v45 = vadd.f32 %v1152_v43, %v410_v44  ;;  %v1325_v46 = vpop.f32.mrb[1].mxu1 }
 0x284   :  { %v413_v47 = vpop.f32.mrb[2].mxu1 }
 0x285   :  { %v417_v48 = vmul.f32 0.2, %v411_v45  ;;  %v414_v49 = vadd.f32 %v1152_v43, %v413_v47  ;;  %v1326_v50 = vpop.f32.mrb[3].mxu1 }
 0x287   :  { %v418_v51 = vmul.f32 0.2, %v414_v49  ;;  %v419_v52 = vmax.f32 %v411_v45, %v417_v48 }
 0x289   :  { %v420_v53 = vmax.f32 %v414_v49, %v418_v51 }
 0x28b   :  { %v421_v54 = vpack.c.bf16 %v420_v53, %v419_v52  ;;  %v1517_v52 = vld [vmem:[#allocation14 + $0x28] sm:$0xff]   ;;  %v1518_v53 = vld [vmem:[#allocation14 + $0x30] sm:$0xff]  }
 0x28d   :  { %1344 = vmatmul.mubr.bf16.vlgmr.msra.gmra.mrb[4].mxu0 %v421_v54  ;;  %v1519_v54 = vld [vmem:[#allocation14 + $0x38] sm:$0xff]  }
 0x28e   :  { %1383 = vmatprep.mubr.msk.bf16.mxu0 %vm1772_vm0, %v1771_v0  ;;  %1368 = vmatpush3.bf16.msra.mxu0 %v1496_v58  ;;  %v1523_v58 = vld [vmem:[#allocation16 + $0x18] sm:$0xff]  }
 0x28f   :  { %1369 = vmatprep.subr.bf16.mxu0 %v1771_v0 }
 0x292   :  { %1370 = vmatpush3.bf16.msra.mxu0 %v1497_v59  ;;  %v1524_v59 = vld [vmem:[#allocation16 + $0x20] sm:$0xff]  }
 0x293   :  { %1371 = vmatprep.subr.bf16.mxu0 %v1771_v0 }
 0x296   :  { %1372 = vmatpush3.bf16.msra.mxu0 %v1498_v60  ;;  %v1188_v60 = vld [vmem:[%s2159_s14] ss:$0 sm:$0xff] }
 0x297   :  { %1373 = vmatprep.subr.bf16.mxu0 %v1771_v0 }
 0x29a   :  { %1374 = vmatpush3.bf16.msra.mxu0 %v1499_v61 }
 0x29b   :  { %1375 = vmatprep.subr.bf16.mxu0 %v1771_v0 }
 0x29e   :  { %1376 = vmatpush3.bf16.msra.mxu0 %v1500_v62 }
 0x29f   :  { %1377 = vmatprep.subr.bf16.mxu0 %v1771_v0 }
 0x2a2   :  { %1378 = vmatpush3.bf16.msra.mxu0 %v1501_v12  ;;  %v1197_v12 = vld [vmem:[%s2160_s15] ss:$0 sm:$0xff]  ;;  %s1726_s15 = scalar_lea.vmem %s1127_s5, 256 }
 0x2a3   :  { %1379 = vmatprep.subr.bf16.mxu0 %v1771_v0  ;;  %p1727_p2 = scmp.ne.s32.totalorder %s1127_s5, %s1726_s15  ;;  %p1732_p4 = scmp.lt.s32.totalorder %s1726_s15, %s1726_s15 }
 0x2a5   :  { %p1733_p5 = por %p1732_p4, %p1731_p3 }
 0x2a6   :  { %1380 = vmatpush3.bf16.msra.mxu0 %v1502_v13 }
 0x2a7   :  { %1381 = vmatprep.subr.bf16.mxu0 %v1771_v0  ;;  %p1734_p6 = pnand %p1733_p5, %p1727_p2 }
 0x2aa   :  { %1382 = vmatpush3.bf16.msra.mxu0 %v1503_v14 }
 0x2ab   :  { %1407 = vmatprep.subr.bf16.mxu0 %v1771_v0 }
 0x360   :  { %v527_v1 = vpop.f32.mrb[4].mxu0 }
 0x361   :  { %v528_v2 = vadd.f32 %v1161_v63, %v527_v1  ;;  %v1345_v3 = vpop.f32.mrb[5].mxu0 }
 0x362   :  { %v530_v4 = vpop.f32.mrb[6].mxu0 }
 0x363   :  { %v534_v5 = vmul.f32 0.2, %v528_v2  ;;  %v531_v6 = vadd.f32 %v1161_v63, %v530_v4  ;;  %v1346_v7 = vpop.f32.mrb[7].mxu0 }
 0x365   :  { %v535_v8 = vmul.f32 0.2, %v531_v6  ;;  %v536_v9 = vmax.f32 %v528_v2, %v534_v5 }
 0x367   :  { %v537_v10 = vmax.f32 %v531_v6, %v535_v8 }
 0x369   :  { %v538_v11 = vpack.c.bf16 %v537_v10, %v536_v9  ;;  %v1525_v9 = vld [vmem:[#allocation16 + $0x28] sm:$0xff]   ;;  %v1526_v10 = vld [vmem:[#allocation16 + $0x30] sm:$0xff]  }
 0x36b   :  { %1364 = vmatmul.mubr.bf16.vlgmr.msra.gmra.mrb[4].mxu1 %v538_v11  ;;  %v1527_v11 = vld [vmem:[#allocation16 + $0x38] sm:$0xff]  }
 0x36c   :  { %1403 = vmatprep.mubr.msk.bf16.mxu1 %vm1772_vm0, %v1771_v0  ;;  %1388 = vmatpush3.bf16.msra.mxu1 %v1504_v15 }
 0x36d   :  { %1389 = vmatprep.subr.bf16.mxu1 %v1771_v0 }
 0x370   :  { %1390 = vmatpush3.bf16.msra.mxu1 %v1505_v16 }
 0x371   :  { %1391 = vmatprep.subr.bf16.mxu1 %v1771_v0 }
 0x374   :  { %1392 = vmatpush3.bf16.msra.mxu1 %v1506_v17 }
 0x375   :  { %1393 = vmatprep.subr.bf16.mxu1 %v1771_v0 }
 0x378   :  { %1394 = vmatpush3.bf16.msra.mxu1 %v1507_v18 }
 0x379   :  { %1395 = vmatprep.subr.bf16.mxu1 %v1771_v0 }
 0x37c   :  { %1396 = vmatpush3.bf16.msra.mxu1 %v1508_v19 }
 0x37d   :  { %1397 = vmatprep.subr.bf16.mxu1 %v1771_v0 }
 0x380   :  { %1398 = vmatpush3.bf16.msra.mxu1 %v1509_v32 }
 0x381   :  { %1399 = vmatprep.subr.bf16.mxu1 %v1771_v0 }
 0x384   :  { %1400 = vmatpush3.bf16.msra.mxu1 %v1510_v33 }
 0x385   :  { %1401 = vmatprep.subr.bf16.mxu1 %v1771_v0 }
 0x388   :  { %1402 = vmatpush3.bf16.msra.mxu1 %v1511_v34 }
 0x389   :  { %1427 = vmatprep.subr.bf16.mxu1 %v1771_v0 }
 0x43e   :  { %v644_v21 = vpop.f32.mrb[4].mxu1 }
 0x43f   :  { %v645_v22 = vadd.f32 %v1170_v20, %v644_v21  ;;  %v1365_v23 = vpop.f32.mrb[5].mxu1 }
 0x440   :  { %v647_v24 = vpop.f32.mrb[6].mxu1 }
 0x441   :  { %v651_v25 = vmul.f32 0.2, %v645_v22  ;;  %v648_v26 = vadd.f32 %v1170_v20, %v647_v24  ;;  %v1366_v27 = vpop.f32.mrb[7].mxu1 }
 0x443   :  { %v652_v28 = vmul.f32 0.2, %v648_v26  ;;  %v653_v29 = vmax.f32 %v645_v22, %v651_v25 }
 0x445   :  { %v654_v30 = vmax.f32 %v648_v26, %v652_v28 }
 0x447   :  { %v655_v31 = vpack.c.bf16 %v654_v30, %v653_v29 }
 0x449   :  { %1384 = vmatmul.mubr.bf16.vlgmr.msra.gmra.mrb[8].mxu0 %v655_v31 }
 0x44a   :  { %1423 = vmatprep.mubr.msk.bf16.mxu0 %vm1772_vm0, %v1771_v0  ;;  %1408 = vmatpush3.bf16.msra.mxu0 %v1512_v35 }
 0x44b   :  { %1409 = vmatprep.subr.bf16.mxu0 %v1771_v0 }
 0x44e   :  { %1410 = vmatpush3.bf16.msra.mxu0 %v1513_v36 }
 0x44f   :  { %1411 = vmatprep.subr.bf16.mxu0 %v1771_v0 }
 0x452   :  { %1412 = vmatpush3.bf16.msra.mxu0 %v1514_v37 }
 0x453   :  { %1413 = vmatprep.subr.bf16.mxu0 %v1771_v0 }
 0x456   :  { %1414 = vmatpush3.bf16.msra.mxu0 %v1515_v38 }
 0x457   :  { %1415 = vmatprep.subr.bf16.mxu0 %v1771_v0 }
 0x45a   :  { %1416 = vmatpush3.bf16.msra.mxu0 %v1516_v39 }
 0x45b   :  { %1417 = vmatprep.subr.bf16.mxu0 %v1771_v0 }
 0x45e   :  { %1418 = vmatpush3.bf16.msra.mxu0 %v1517_v52 }
 0x45f   :  { %1419 = vmatprep.subr.bf16.mxu0 %v1771_v0 }
 0x462   :  { %1420 = vmatpush3.bf16.msra.mxu0 %v1518_v53 }
 0x463   :  { %1421 = vmatprep.subr.bf16.mxu0 %v1771_v0 }
 0x466   :  { %1422 = vmatpush3.bf16.msra.mxu0 %v1519_v54 }
 0x51c   :  { %v761_v41 = vpop.f32.mrb[8].mxu0 }
 0x51d   :  { %v762_v42 = vadd.f32 %v1179_v40, %v761_v41  ;;  %v1385_v43 = vpop.f32.mrb[9].mxu0 }
 0x51e   :  { %v764_v44 = vpop.f32.mrb[10].mxu0 }
 0x51f   :  { %v768_v45 = vmul.f32 0.2, %v762_v42  ;;  %v765_v46 = vadd.f32 %v1179_v40, %v764_v44  ;;  %v1386_v47 = vpop.f32.mrb[11].mxu0 }
 0x521   :  { %v769_v48 = vmul.f32 0.2, %v765_v46  ;;  %v770_v49 = vmax.f32 %v762_v42, %v768_v45 }
 0x523   :  { %v771_v50 = vmax.f32 %v765_v46, %v769_v48 }
 0x525   :  { %v772_v51 = vpack.c.bf16 %v771_v50, %v770_v49 }
 0x527   :  { %1404 = vmatmul.mubr.bf16.vlgmr.msra.gmra.mrb[8].mxu1 %v772_v51 }
 0x528   :  { %1443 = vmatprep.mubr.msk.bf16.mxu1 %vm1772_vm0, %v1771_v0  ;;  %1428 = vmatpush3.bf16.msra.mxu1 %v1520_v55 }
 0x529   :  { %1429 = vmatprep.subr.bf16.mxu1 %v1771_v0 }
 0x52c   :  { %1430 = vmatpush3.bf16.msra.mxu1 %v1521_v56 }
 0x52d   :  { %1431 = vmatprep.subr.bf16.mxu1 %v1771_v0 }
 0x530   :  { %1432 = vmatpush3.bf16.msra.mxu1 %v1522_v57 }
 0x531   :  { %1433 = vmatprep.subr.bf16.mxu1 %v1771_v0 }
 0x534   :  { %1434 = vmatpush3.bf16.msra.mxu1 %v1523_v58 }
 0x535   :  { %1435 = vmatprep.subr.bf16.mxu1 %v1771_v0 }
 0x538   :  { %1436 = vmatpush3.bf16.msra.mxu1 %v1524_v59 }
 0x539   :  { %1437 = vmatprep.subr.bf16.mxu1 %v1771_v0 }
 0x53c   :  { %1438 = vmatpush3.bf16.msra.mxu1 %v1525_v9 }
 0x53d   :  { %1439 = vmatprep.subr.bf16.mxu1 %v1771_v0 }
 0x540   :  { %1440 = vmatpush3.bf16.msra.mxu1 %v1526_v10 }
 0x541   :  { %1441 = vmatprep.subr.bf16.mxu1 %v1771_v0  ;;  %v1206_v0 = vld [vmem:[%s2161_s16] ss:$0 sm:$0xff] }
 0x544   :  { %1442 = vmatpush3.bf16.msra.mxu1 %v1527_v11 }
 0x5fa   :  { %v878_v61 = vpop.f32.mrb[8].mxu1 }
 0x5fb   :  { %v879_v62 = vadd.f32 %v1188_v60, %v878_v61  ;;  %v1405_v63 = vpop.f32.mrb[9].mxu1 }
 0x5fc   :  { %v881_v1 = vpop.f32.mrb[10].mxu1 }
 0x5fd   :  { %v885_v2 = vmul.f32 0.2, %v879_v62  ;;  %v882_v3 = vadd.f32 %v1188_v60, %v881_v1  ;;  %v1406_v4 = vpop.f32.mrb[11].mxu1 }
 0x5ff   :  { %v886_v5 = vmul.f32 0.2, %v882_v3  ;;  %v887_v6 = vmax.f32 %v879_v62, %v885_v2 }
 0x601   :  { %v888_v7 = vmax.f32 %v882_v3, %v886_v5 }
 0x603   :  { %v889_v8 = vpack.c.bf16 %v888_v7, %v887_v6 }
 0x605   :  { %1424 = vmatmul.mubr.bf16.vlgmr.msra.gmra.mrb[12].mxu0 %v889_v8 }
 0x6d8   :  { %v995_v13 = vpop.f32.mrb[12].mxu0 }
 0x6d9   :  { %v996_v14 = vadd.f32 %v1197_v12, %v995_v13  ;;  %v1425_v15 = vpop.f32.mrb[13].mxu0 }
 0x6da   :  { %v998_v16 = vpop.f32.mrb[14].mxu0 }
 0x6db   :  { %v1002_v17 = vmul.f32 0.2, %v996_v14  ;;  %v999_v18 = vadd.f32 %v1197_v12, %v998_v16  ;;  %v1426_v19 = vpop.f32.mrb[15].mxu0 }
 0x6dd   :  { %v1003_v20 = vmul.f32 0.2, %v999_v18  ;;  %v1004_v21 = vmax.f32 %v996_v14, %v1002_v17 }
 0x6df   :  { %v1005_v22 = vmax.f32 %v999_v18, %v1003_v20 }
 0x6e1   :  { %v1006_v23 = vpack.c.bf16 %v1005_v22, %v1004_v21 }
 0x6e3   :  { %1444 = vmatmul.mubr.bf16.vlgmr.msra.gmra.mrb[12].mxu1 %v1006_v23 }
 0x7b6   :  { %v1112_v24 = vpop.f32.mrb[12].mxu1 }
 0x7b7   :  { %v1113_v25 = vadd.f32 %v1206_v0, %v1112_v24  ;;  %v1445_v26 = vpop.f32.mrb[13].mxu1 }
 0x7b8   :  { %v1115_v27 = vpop.f32.mrb[14].mxu1 }
 0x7b9   :  { %1119 = vst [vmem:[#allocation17] sm:$0xff] %v1113_v25  ;;  %v1116_v28 = vadd.f32 %v1206_v0, %v1115_v27  ;;  %v1446_v29 = vpop.f32.mrb[15].mxu1 }
 0x7bb   :  { %1120 = vst [vmem:[#allocation17 + $0x8] sm:$0xff] %v1116_v28 }
 0x7bc   :  { %1737 = shalt.err (!%p1734_p6)
}
 0x7bd   :  { %s2171_s20 = sld [smem:[#allocation26_spill]] }
 0x7c3   :  { %s1738_s3 = scalar_lea.hbm %s2171_s20, 256 }
 0x7c4   :  { %p1739_p7 = scmp.ne.s32.totalorder %s2171_s20, %s1738_s3  ;;  %p1742_p8 = scmp.lt.u32.totalorder %s1738_s3, %s2171_s20 }
 0x7c6   :  { %p1744_p9 = pnand %p1742_p8, %p1739_p7 }
 0x7c8   :  { %1747 = shalt.err (!%p1744_p9)
}
 0x7c9   :  { %s1774_s17 = smov 128   ;;  %s1775_s28 = smov 8  }
 0x7ca   :  { %1132 = dma.vmem_to_hbm [thread:$0]  %s1127_s5, 256, %s2171_s20, [#allocation4], %s1774_s17, %s1774_s17, %s1775_s28  }
 0x7cb   :  { %1758 = dma.done.wait [#allocation4], 256  }
 0x7cc   :  { %1759 = vsyncadd [#allocation4], 4294967040 }
 0x7cd   :  { %1136 = vsyncpa [#allocation3], 1 }
 0x7ce   :  { %1137 = vsyncpa [#allocation6], 1 }
 0x7cf   :  { %1138 = vsyncpa [#allocation9], 1 }
 0x7d0   :  { %1139 = vsyncpa [#allocation12], 1 }
 0x7d1   :  { %1140 = vsyncpa [#allocation15], 1 }
 0x7d2   :  { %1141 = vsyncpa [#allocation4], 1 }

</bundles_post_ra>
